<compile_context>
chip_gen: v7x
topology: tpu7x:2x2x1
jax: 0.10.0
libtpu: 0.0.40
codegen_flags: <defaults>
</compile_context>

<pallas_src>
import functools

import numpy as np

import jax
import jax.numpy as jnp
from jax.experimental import pallas as pl
from jax.experimental.pallas import tpu as pltpu


# --------------------------------------------------------------------------- #
# kernel
# --------------------------------------------------------------------------- #
_ROW_MASK = {-1: 0, 1: 1}   # edge-mask row index for dh = -1 / +1
_COL_MASK = {-1: 2, 1: 3}   # edge-mask row index for dw = -1 / +1


def _tap_mask(masks_ref, dh, dw):
    """(1, HW) bf16 validity mask for tap (dh, dw); None for the centre tap."""
    m = None
    if dh != 0:
        r = _ROW_MASK[dh]
        m = masks_ref[r:r + 1, :]
    if dw != 0:
        c = _COL_MASK[dw]
        mw = masks_ref[c:c + 1, :]
        m = mw if m is None else m * mw          # tiny (1, HW) bf16 product
    return m


def _conv3x3_rowgrouped(y, wg_ref, masks_ref, W):
    """3x3 'SAME' conv of y (C, H*W) f32 with wg_ref (3, Cout, 3*C) bf16 weights.

    The im2col is built in-registers: shifts along the flattened spatial axis
    are XLU lane rotations (pltpu.roll, jnp.roll convention: out[l]=in[l-shift]);
    out-of-image positions are zeroed with precomputed edge masks applied in
    bf16 after the cast.  One dh row at a time a (3*C, HW) bf16 tap slab is
    built and immediately consumed by one MXU dot (K = 3*C), accumulating in
    f32 -- peak im2col VMEM is ~3x smaller than a full (9*C, HW) slab.
    """
    C, HW = y.shape
    acc = None
    for g, dh in enumerate((-1, 0, 1)):
        y_g = y if dh == 0 else pltpu.roll(y, shift=(-dh * W) % HW, axis=1)
        taps = []
        for dw in (-1, 0, 1):
            t = y_g if dw == 0 else pltpu.roll(y_g, shift=(-dw) % HW, axis=1)
            tb = t.astype(jnp.bfloat16)
            m = _tap_mask(masks_ref, dh, dw)
            if m is not None:
                tb = tb * m
            taps.append(tb)
        slab = jnp.concatenate(taps, axis=0)                   # (3*C, HW) bf16
        part = jnp.dot(wg_ref[g], slab, preferred_element_type=jnp.float32)
        acc = part if acc is None else acc + part
    return acc                                                 # (Cout, HW) f32


def conv_block_kernel(x_ref, masks_ref, w1_ref, s1_ref, b1_ref,
                      w2_ref, s2_ref, b2_ref,
                      wse1t_ref, bse1_ref, wse2_ref, bse2_ref,
                      o_ref, *, W):
    """Fused (conv3x3->BN->ReLU) x2 + squeeze-excitation for ONE image.

    x_ref    : (1, Cin_p, HW)      bf16  raw input, channels-first flat layout
    masks_ref: (4, HW)             bf16  edge masks (dh=-1, dh=+1, dw=-1, dw=+1)
    w1_ref   : (3, Cout, 3*Cin_p)  bf16  conv1 weights, dh-grouped
    w2_ref   : (3, Cout, 3*Cout)   bf16  conv2 weights, dh-grouped
    s*/b*    : (Cout, 1)           f32   folded BN scale / shift
    wse1t_ref: (Cout, Cr) f32, bse1_ref: (1, Cr) f32
    wse2_ref : (Cout, Cr) f32, bse2_ref: (Cout, 1) f32
    o_ref    : (1, Cout, HW)              (== NCHW flattened spatially)
    """
    # ---- conv1 + BN + ReLU (in-kernel im2col: no wrapper-side 9x inflation) --
    x = x_ref[0].astype(jnp.float32)                           # (Cin_p, HW)
    y1 = _conv3x3_rowgrouped(x, w1_ref, masks_ref, W)
    y1 = jnp.maximum(y1 * s1_ref[...] + b1_ref[...], 0.0)

    # ---- conv2 + BN + ReLU ---------------------------------------------------
    y2 = _conv3x3_rowgrouped(y1, w2_ref, masks_ref, W)
    y2 = jnp.maximum(y2 * s2_ref[...] + b2_ref[...], 0.0)

    # ---- squeeze-excitation on VPU/XLU (no 1-column MXU drain/refill) --------
    pooled = jnp.mean(y2, axis=1, keepdims=True)               # (Cout, 1)
    z1 = jnp.sum(wse1t_ref[...] * pooled, axis=0, keepdims=True) + bse1_ref[...]
    z1 = jnp.maximum(z1, 0.0)                                  # (1, Cr)
    z2 = jnp.sum(wse2_ref[...] * z1, axis=1, keepdims=True) + bse2_ref[...]
    gate = jax.nn.sigmoid(z2)                                  # (Cout, 1)

    o_ref[...] = (y2 * gate)[None].astype(o_ref.dtype)         # (1, Cout, HW)


# --------------------------------------------------------------------------- #
# wrapper
# --------------------------------------------------------------------------- #
def fold_bn(gamma, beta, mean, var, eps=1e-5):
    scale = gamma / jnp.sqrt(var + eps)
    shift = beta - mean * scale
    return scale.reshape(-1, 1), shift.reshape(-1, 1)


def _conv_w_grouped(w_oihw):
    # (O, I, 3, 3) -> (3, O, 3*I); group index g = kh (= dh+1); within a group
    # the column index is kw*I + i, matching the kernel's dw-major,
    # channel-minor tap slab order.
    o, i = w_oihw.shape[0], w_oihw.shape[1]
    return jnp.transpose(w_oihw, (2, 0, 3, 1)).reshape(3, o, 3 * i)


def _make_edge_masks(H, W):
    # row 0: dh=-1 valid; row 1: dh=+1 valid; row 2: dw=-1 valid; row 3: dw=+1.
    h = np.arange(H)[:, None]
    w = np.arange(W)[None, :]
    rows = [
        np.broadcast_to(h >= 1, (H, W)),
        np.broadcast_to(h <= H - 2, (H, W)),
        np.broadcast_to(w >= 1, (H, W)),
        np.broadcast_to(w <= W - 2, (H, W)),
    ]
    stacked = np.stack([r.reshape(H * W) for r in rows]).astype(np.float32)
    return jnp.asarray(stacked)                                 # (4, H*W)


@functools.lru_cache(maxsize=None)
def _vmem_limit_bytes():
    # generation-aware: ~75% of physical VMEM, capped at 100 MiB.
    cap = 64 * 1024 * 1024                                      # safe fallback
    try:
        info = pltpu.get_tpu_info()
        cap = int(getattr(info, "vmem_capacity_bytes", cap))
    except Exception:
        pass
    return int(min(cap * 3 // 4, 100 * 1024 * 1024))


@functools.partial(jax.jit, static_argnames=("out_dtype", "vmem_limit_bytes"))
def _conv_block_forward(x_nchw, params, *, out_dtype, vmem_limit_bytes):
    N, Cin, H, W = x_nchw.shape
    Cout = params["w1"].shape[0]
    Cr = params["wse1"].shape[0]
    HW = H * W

    # Pad Cin to the bf16 sublane-packing granularity (16) so the in-kernel tap
    # concatenation stays tile-aligned; padded channels are zero in both the
    # activation and the weights, so they contribute nothing.
    cin_p = ((Cin + 15) // 16) * 16

    x_flat = x_nchw.reshape(N, Cin, HW).astype(jnp.bfloat16)
    w1 = params["w1"]
    if cin_p != Cin:
        x_flat = jnp.pad(x_flat, ((0, 0), (0, cin_p - Cin), (0, 0)))
        w1 = jnp.pad(w1, ((0, 0), (0, cin_p - Cin), (0, 0), (0, 0)))

    masks = _make_edge_masks(H, W).astype(jnp.bfloat16)         # (4, HW)
    w1g = _conv_w_grouped(w1).astype(jnp.bfloat16)              # (3, Cout, 3*cin_p)
    w2g = _conv_w_grouped(params["w2"]).astype(jnp.bfloat16)    # (3, Cout, 3*Cout)
    s1, b1 = fold_bn(*params["bn1"])
    s2, b2 = fold_bn(*params["bn2"])
    wse1t = jnp.transpose(params["wse1"][:, :, 0, 0])           # (Cout, Cr)
    bse1 = params["bse1"].reshape(1, Cr)
    wse2 = params["wse2"][:, :, 0, 0]                           # (Cout, Cr)
    bse2 = params["bse2"].reshape(Cout, 1)

    kernel = functools.partial(conv_block_kernel, W=W)

    out = pl.pallas_call(
        kernel,
        out_shape=jax.ShapeDtypeStruct((N, Cout, HW), out_dtype),
        grid_spec=pltpu.PrefetchScalarGridSpec(
            num_scalar_prefetch=0,
            grid=(N,),
            in_specs=[
                pl.BlockSpec((1, cin_p, HW), lambda n: (n, 0, 0)),
                pl.BlockSpec((4, HW), lambda n: (0, 0)),
                pl.BlockSpec((3, Cout, 3 * cin_p), lambda n: (0, 0, 0)),
                pl.BlockSpec((Cout, 1), lambda n: (0, 0)),
                pl.BlockSpec((Cout, 1), lambda n: (0, 0)),
                pl.BlockSpec((3, Cout, 3 * Cout), lambda n: (0, 0, 0)),
                pl.BlockSpec((Cout, 1), lambda n: (0, 0)),
                pl.BlockSpec((Cout, 1), lambda n: (0, 0)),
                pl.BlockSpec((Cout, Cr), lambda n: (0, 0)),
                pl.BlockSpec((1, Cr), lambda n: (0, 0)),
                pl.BlockSpec((Cout, Cr), lambda n: (0, 0)),
                pl.BlockSpec((Cout, 1), lambda n: (0, 0)),
            ],
            out_specs=pl.BlockSpec((1, Cout, HW), lambda n: (n, 0, 0)),
        ),
        compiler_params=pltpu.CompilerParams(
            dimension_semantics=("parallel",),
            vmem_limit_bytes=vmem_limit_bytes,
        ),
    )(x_flat, masks, w1g, s1, b1, w2g, s2, b2, wse1t, bse1, wse2, bse2)

    # (N, Cout, H*W) is already NCHW, flattened spatially.
    return out.reshape(N, Cout, H, W)


def conv_block_forward(x_nchw, params, out_dtype=jnp.float32):
    return _conv_block_forward(x_nchw, params, out_dtype=out_dtype,
                               vmem_limit_bytes=_vmem_limit_bytes())


# --------------------------------------------------------------------------- #
# pure-JAX reference (mimics bf16 MXU operands so the comparison stays tight)
# --------------------------------------------------------------------------- #
def reference_forward(x_nchw, params):
    def conv3x3_bn_relu(x, w_oihw, bn):
        y = jax.lax.conv_general_dilated(
            x.astype(jnp.bfloat16), w_oihw.astype(jnp.bfloat16),
            window_strides=(1, 1), padding="SAME",
            dimension_numbers=("NCHW", "OIHW", "NCHW"),
            preferred_element_type=jnp.float32)
        s, b = fold_bn(*bn)
        return jnp.maximum(y * s.reshape(1, -1, 1, 1) + b.reshape(1, -1, 1, 1), 0.0)

    y = conv3x3_bn_relu(x_nchw, params["w1"], params["bn1"])
    y = conv3x3_bn_relu(y, params["w2"], params["bn2"])
    pooled = jnp.mean(y, axis=(2, 3))                                   # (N, C)
    z1 = jnp.maximum(pooled @ params["wse1"][:, :, 0, 0].T + params["bse1"], 0.0)
    z2 = jax.nn.sigmoid(z1 @ params["wse2"][:, :, 0, 0].T + params["bse2"])
    return y * z2[:, :, None, None]


def make_params(key, in_c, out_c, reduction=16):
    cr = out_c // reduction
    ks = jax.random.split(key, 12)
    return {
        "w1": jax.random.normal(ks[0], (out_c, in_c, 3, 3), jnp.float32) * 0.1,
        "bn1": (jax.random.uniform(ks[1], (out_c,), minval=0.5, maxval=1.5),
                jax.random.normal(ks[2], (out_c,)) * 0.1,
                jax.random.normal(ks[3], (out_c,)) * 0.1,
                jax.random.uniform(ks[4], (out_c,), minval=0.5, maxval=1.5)),
        "w2": jax.random.normal(ks[5], (out_c, out_c, 3, 3), jnp.float32) * 0.1,
        "bn2": (jax.random.uniform(ks[6], (out_c,), minval=0.5, maxval=1.5),
                jax.random.normal(ks[7], (out_c,)) * 0.1,
                jax.random.normal(ks[8], (out_c,)) * 0.1,
                jax.random.uniform(ks[9], (out_c,), minval=0.5, maxval=1.5)),
        "wse1": jax.random.normal(ks[10], (cr, out_c, 1, 1), jnp.float32) * 0.1,
        "bse1": jnp.zeros((cr,), jnp.float32) + 0.01,
        "wse2": jax.random.normal(ks[11], (out_c, cr, 1, 1), jnp.float32) * 0.1,
        "bse2": jnp.zeros((out_c,), jnp.float32) + 0.01,
    }


if __name__ == "__main__":
    key = jax.random.PRNGKey(0)
    k_x, k_p = jax.random.split(key)

    N, Cin, H, W = 2, 4, 16, 16
    Cout = 32  # out_c (>= reduction=16 so the SE bottleneck is nonzero)

    x = jax.random.normal(k_x, (N, Cin, H, W), jnp.float32)
    params = make_params(k_p, Cin, Cout)

    out = conv_block_forward(x, params)
    out = jax.block_until_ready(out)

    ref = reference_forward(x, params)
    assert out.shape == (N, Cout, H, W)
    err = float(jnp.max(jnp.abs(out - ref)))
    # tolerance reflects bf16 MXU operands (both kernel and reference).
    assert jnp.allclose(out, ref, rtol=5e-3, atol=5e-3), f"max abs err = {err}"

    print("KERNEL_OK")
</pallas_src>

<mosaic_0001>
module attributes {stable_mosaic.version = 11 : i64} {
  func.func @conv_block_kernel(%arg0: i32, %arg1: memref<1x16x256xbf16, #tpu.memory_space<vmem>>, %arg2: memref<4x256xbf16, #tpu.memory_space<vmem>>, %arg3: memref<3x32x48xbf16, #tpu.memory_space<vmem>>, %arg4: memref<32x1xf32, #tpu.memory_space<vmem>>, %arg5: memref<32x1xf32, #tpu.memory_space<vmem>>, %arg6: memref<3x32x96xbf16, #tpu.memory_space<vmem>>, %arg7: memref<32x1xf32, #tpu.memory_space<vmem>>, %arg8: memref<32x1xf32, #tpu.memory_space<vmem>>, %arg9: memref<32x2xf32, #tpu.memory_space<vmem>>, %arg10: memref<1x2xf32, #tpu.memory_space<vmem>>, %arg11: memref<32x2xf32, #tpu.memory_space<vmem>>, %arg12: memref<32x1xf32, #tpu.memory_space<vmem>>, %arg13: memref<1x32x256xf32, #tpu.memory_space<vmem>>) attributes {dimension_semantics = [#tpu.dimension_semantics<parallel>], iteration_bounds = array<i64: 2>, scalar_prefetch = 0 : i64, scratch_operands = 0 : i64, tpu.core_type = #tpu.core_type<tc>, window_params = [{transform_indices = @transform_0, window_bounds = array<i64: 1, 16, 256>}, {pipeline_mode = #tpu.pipeline_mode<synchronous>, transform_indices = @transform_1, window_bounds = array<i64: 4, 256>}, {pipeline_mode = #tpu.pipeline_mode<synchronous>, transform_indices = @transform_2, window_bounds = array<i64: 3, 32, 48>}, {pipeline_mode = #tpu.pipeline_mode<synchronous>, transform_indices = @transform_3, window_bounds = array<i64: 32, 1>}, {pipeline_mode = #tpu.pipeline_mode<synchronous>, transform_indices = @transform_4, window_bounds = array<i64: 32, 1>}, {pipeline_mode = #tpu.pipeline_mode<synchronous>, transform_indices = @transform_5, window_bounds = array<i64: 3, 32, 96>}, {pipeline_mode = #tpu.pipeline_mode<synchronous>, transform_indices = @transform_6, window_bounds = array<i64: 32, 1>}, {pipeline_mode = #tpu.pipeline_mode<synchronous>, transform_indices = @transform_7, window_bounds = array<i64: 32, 1>}, {pipeline_mode = #tpu.pipeline_mode<synchronous>, transform_indices = @transform_8, window_bounds = array<i64: 32, 2>}, {pipeline_mode = #tpu.pipeline_mode<synchronous>, transform_indices = @transform_9, window_bounds = array<i64: 1, 2>}, {pipeline_mode = #tpu.pipeline_mode<synchronous>, transform_indices = @transform_10, window_bounds = array<i64: 32, 2>}, {pipeline_mode = #tpu.pipeline_mode<synchronous>, transform_indices = @transform_11, window_bounds = array<i64: 32, 1>}, {transform_indices = @transform_12, window_bounds = array<i64: 1, 32, 256>}]} {
    %c0 = arith.constant 0 : index
    %c0_0 = arith.constant 0 : index
    %c0_1 = arith.constant 0 : index
    %0 = vector.load %arg1[%c0, %c0_0, %c0_1] : memref<1x16x256xbf16, #tpu.memory_space<vmem>>, vector<1x16x256xbf16>
    %1 = vector.shape_cast %0 : vector<1x16x256xbf16> to vector<16x256xbf16>
    %2 = arith.extf %1 : vector<16x256xbf16> to vector<16x256xf32>
    %c16_i32 = arith.constant 16 : i32
    %3 = tpu.dynamic_rotate %2 by %c16_i32 dim 1 : vector<16x256xf32>, i32 -> vector<16x256xf32>
    %c1_i32 = arith.constant 1 : i32
    %4 = tpu.dynamic_rotate %3 by %c1_i32 dim 1 : vector<16x256xf32>, i32 -> vector<16x256xf32>
    %5 = arith.truncf %4 : vector<16x256xf32> to vector<16x256xbf16>
    %c0_2 = arith.constant 0 : index
    %c0_3 = arith.constant 0 : index
    %6 = vector.load %arg2[%c0_2, %c0_3] : memref<4x256xbf16, #tpu.memory_space<vmem>>, vector<1x256xbf16>
    %c2 = arith.constant 2 : index
    %c0_4 = arith.constant 0 : index
    %7 = vector.load %arg2[%c2, %c0_4] : memref<4x256xbf16, #tpu.memory_space<vmem>>, vector<1x256xbf16>
    %8 = arith.mulf %6, %7 : vector<1x256xbf16>
    %9 = vector.broadcast %8 : vector<1x256xbf16> to vector<16x256xbf16>
    %10 = arith.mulf %5, %9 : vector<16x256xbf16>
    %11 = arith.truncf %3 : vector<16x256xf32> to vector<16x256xbf16>
    %c0_5 = arith.constant 0 : index
    %c0_6 = arith.constant 0 : index
    %12 = vector.load %arg2[%c0_5, %c0_6] : memref<4x256xbf16, #tpu.memory_space<vmem>>, vector<1x256xbf16>
    %13 = vector.broadcast %12 : vector<1x256xbf16> to vector<16x256xbf16>
    %14 = arith.mulf %11, %13 : vector<16x256xbf16>
    %c255_i32 = arith.constant 255 : i32
    %15 = tpu.dynamic_rotate %3 by %c255_i32 dim 1 : vector<16x256xf32>, i32 -> vector<16x256xf32>
    %16 = arith.truncf %15 : vector<16x256xf32> to vector<16x256xbf16>
    %c0_7 = arith.constant 0 : index
    %c0_8 = arith.constant 0 : index
    %17 = vector.load %arg2[%c0_7, %c0_8] : memref<4x256xbf16, #tpu.memory_space<vmem>>, vector<1x256xbf16>
    %c3 = arith.constant 3 : index
    %c0_9 = arith.constant 0 : index
    %18 = vector.load %arg2[%c3, %c0_9] : memref<4x256xbf16, #tpu.memory_space<vmem>>, vector<1x256xbf16>
    %19 = arith.mulf %17, %18 : vector<1x256xbf16>
    %20 = vector.broadcast %19 : vector<1x256xbf16> to vector<16x256xbf16>
    %21 = arith.mulf %16, %20 : vector<16x256xbf16>
    %22 = tpu.concatenate %10, %14, %21 in 0 : vector<16x256xbf16>, vector<16x256xbf16>, vector<16x256xbf16> -> vector<48x256xbf16>
    %c0_10 = arith.constant 0 : index
    %c0_11 = arith.constant 0 : index
    %c0_12 = arith.constant 0 : index
    %23 = vector.load %arg3[%c0_10, %c0_11, %c0_12] : memref<3x32x48xbf16, #tpu.memory_space<vmem>>, vector<1x32x48xbf16>
    %24 = vector.shape_cast %23 : vector<1x32x48xbf16> to vector<32x48xbf16>
    %cst = arith.constant dense<0.000000e+00> : vector<32x256xf32>
    %25 = tpu.matmul %24, %22, %cst {dimension_numbers = #tpu.dot_dimension_numbers<[1], [0], [0], [1], [0, 0, 1, 1], [], []>} : vector<32x48xbf16>, vector<48x256xbf16>, vector<32x256xf32> -> vector<32x256xf32>
    %c1_i32_13 = arith.constant 1 : i32
    %26 = tpu.dynamic_rotate %2 by %c1_i32_13 dim 1 : vector<16x256xf32>, i32 -> vector<16x256xf32>
    %27 = arith.truncf %26 : vector<16x256xf32> to vector<16x256xbf16>
    %c2_14 = arith.constant 2 : index
    %c0_15 = arith.constant 0 : index
    %28 = vector.load %arg2[%c2_14, %c0_15] : memref<4x256xbf16, #tpu.memory_space<vmem>>, vector<1x256xbf16>
    %29 = vector.broadcast %28 : vector<1x256xbf16> to vector<16x256xbf16>
    %30 = arith.mulf %27, %29 : vector<16x256xbf16>
    %31 = arith.truncf %2 : vector<16x256xf32> to vector<16x256xbf16>
    %c255_i32_16 = arith.constant 255 : i32
    %32 = tpu.dynamic_rotate %2 by %c255_i32_16 dim 1 : vector<16x256xf32>, i32 -> vector<16x256xf32>
    %33 = arith.truncf %32 : vector<16x256xf32> to vector<16x256xbf16>
    %c3_17 = arith.constant 3 : index
    %c0_18 = arith.constant 0 : index
    %34 = vector.load %arg2[%c3_17, %c0_18] : memref<4x256xbf16, #tpu.memory_space<vmem>>, vector<1x256xbf16>
    %35 = vector.broadcast %34 : vector<1x256xbf16> to vector<16x256xbf16>
    %36 = arith.mulf %33, %35 : vector<16x256xbf16>
    %37 = tpu.concatenate %30, %31, %36 in 0 : vector<16x256xbf16>, vector<16x256xbf16>, vector<16x256xbf16> -> vector<48x256xbf16>
    %c1 = arith.constant 1 : index
    %c0_19 = arith.constant 0 : index
    %c0_20 = arith.constant 0 : index
    %38 = vector.load %arg3[%c1, %c0_19, %c0_20] : memref<3x32x48xbf16, #tpu.memory_space<vmem>>, vector<1x32x48xbf16>
    %39 = vector.shape_cast %38 : vector<1x32x48xbf16> to vector<32x48xbf16>
    %cst_21 = arith.constant dense<0.000000e+00> : vector<32x256xf32>
    %40 = tpu.matmul %39, %37, %cst_21 {dimension_numbers = #tpu.dot_dimension_numbers<[1], [0], [0], [1], [0, 0, 1, 1], [], []>} : vector<32x48xbf16>, vector<48x256xbf16>, vector<32x256xf32> -> vector<32x256xf32>
    %41 = arith.addf %25, %40 : vector<32x256xf32>
    %c240_i32 = arith.constant 240 : i32
    %42 = tpu.dynamic_rotate %2 by %c240_i32 dim 1 : vector<16x256xf32>, i32 -> vector<16x256xf32>
    %c1_i32_22 = arith.constant 1 : i32
    %43 = tpu.dynamic_rotate %42 by %c1_i32_22 dim 1 : vector<16x256xf32>, i32 -> vector<16x256xf32>
    %44 = arith.truncf %43 : vector<16x256xf32> to vector<16x256xbf16>
    %c1_23 = arith.constant 1 : index
    %c0_24 = arith.constant 0 : index
    %45 = vector.load %arg2[%c1_23, %c0_24] : memref<4x256xbf16, #tpu.memory_space<vmem>>, vector<1x256xbf16>
    %c2_25 = arith.constant 2 : index
    %c0_26 = arith.constant 0 : index
    %46 = vector.load %arg2[%c2_25, %c0_26] : memref<4x256xbf16, #tpu.memory_space<vmem>>, vector<1x256xbf16>
    %47 = arith.mulf %45, %46 : vector<1x256xbf16>
    %48 = vector.broadcast %47 : vector<1x256xbf16> to vector<16x256xbf16>
    %49 = arith.mulf %44, %48 : vector<16x256xbf16>
    %50 = arith.truncf %42 : vector<16x256xf32> to vector<16x256xbf16>
    %c1_27 = arith.constant 1 : index
    %c0_28 = arith.constant 0 : index
    %51 = vector.load %arg2[%c1_27, %c0_28] : memref<4x256xbf16, #tpu.memory_space<vmem>>, vector<1x256xbf16>
    %52 = vector.broadcast %51 : vector<1x256xbf16> to vector<16x256xbf16>
    %53 = arith.mulf %50, %52 : vector<16x256xbf16>
    %c255_i32_29 = arith.constant 255 : i32
    %54 = tpu.dynamic_rotate %42 by %c255_i32_29 dim 1 : vector<16x256xf32>, i32 -> vector<16x256xf32>
    %55 = arith.truncf %54 : vector<16x256xf32> to vector<16x256xbf16>
    %c1_30 = arith.constant 1 : index
    %c0_31 = arith.constant 0 : index
    %56 = vector.load %arg2[%c1_30, %c0_31] : memref<4x256xbf16, #tpu.memory_space<vmem>>, vector<1x256xbf16>
    %c3_32 = arith.constant 3 : index
    %c0_33 = arith.constant 0 : index
    %57 = vector.load %arg2[%c3_32, %c0_33] : memref<4x256xbf16, #tpu.memory_space<vmem>>, vector<1x256xbf16>
    %58 = arith.mulf %56, %57 : vector<1x256xbf16>
    %59 = vector.broadcast %58 : vector<1x256xbf16> to vector<16x256xbf16>
    %60 = arith.mulf %55, %59 : vector<16x256xbf16>
    %61 = tpu.concatenate %49, %53, %60 in 0 : vector<16x256xbf16>, vector<16x256xbf16>, vector<16x256xbf16> -> vector<48x256xbf16>
    %c2_34 = arith.constant 2 : index
    %c0_35 = arith.constant 0 : index
    %c0_36 = arith.constant 0 : index
    %62 = vector.load %arg3[%c2_34, %c0_35, %c0_36] : memref<3x32x48xbf16, #tpu.memory_space<vmem>>, vector<1x32x48xbf16>
    %63 = vector.shape_cast %62 : vector<1x32x48xbf16> to vector<32x48xbf16>
    %cst_37 = arith.constant dense<0.000000e+00> : vector<32x256xf32>
    %64 = tpu.matmul %63, %61, %cst_37 {dimension_numbers = #tpu.dot_dimension_numbers<[1], [0], [0], [1], [0, 0, 1, 1], [], []>} : vector<32x48xbf16>, vector<48x256xbf16>, vector<32x256xf32> -> vector<32x256xf32>
    %65 = arith.addf %41, %64 : vector<32x256xf32>
    %c0_38 = arith.constant 0 : index
    %c0_39 = arith.constant 0 : index
    %66 = vector.load %arg4[%c0_38, %c0_39] : memref<32x1xf32, #tpu.memory_space<vmem>>, vector<32x1xf32>
    %67 = vector.broadcast %66 : vector<32x1xf32> to vector<32x256xf32>
    %68 = arith.mulf %65, %67 : vector<32x256xf32>
    %c0_40 = arith.constant 0 : index
    %c0_41 = arith.constant 0 : index
    %69 = vector.load %arg5[%c0_40, %c0_41] : memref<32x1xf32, #tpu.memory_space<vmem>>, vector<32x1xf32>
    %70 = vector.broadcast %69 : vector<32x1xf32> to vector<32x256xf32>
    %71 = arith.addf %68, %70 : vector<32x256xf32>
    %cst_42 = arith.constant 0.000000e+00 : f32
    %72 = vector.broadcast %cst_42 : f32 to vector<32x256xf32>
    %73 = arith.maximumf %71, %72 : vector<32x256xf32>
    %c16_i32_43 = arith.constant 16 : i32
    %74 = tpu.dynamic_rotate %73 by %c16_i32_43 dim 1 : vector<32x256xf32>, i32 -> vector<32x256xf32>
    %c1_i32_44 = arith.constant 1 : i32
    %75 = tpu.dynamic_rotate %74 by %c1_i32_44 dim 1 : vector<32x256xf32>, i32 -> vector<32x256xf32>
    %76 = arith.truncf %75 : vector<32x256xf32> to vector<32x256xbf16>
    %c0_45 = arith.constant 0 : index
    %c0_46 = arith.constant 0 : index
    %77 = vector.load %arg2[%c0_45, %c0_46] : memref<4x256xbf16, #tpu.memory_space<vmem>>, vector<1x256xbf16>
    %c2_47 = arith.constant 2 : index
    %c0_48 = arith.constant 0 : index
    %78 = vector.load %arg2[%c2_47, %c0_48] : memref<4x256xbf16, #tpu.memory_space<vmem>>, vector<1x256xbf16>
    %79 = arith.mulf %77, %78 : vector<1x256xbf16>
    %80 = vector.broadcast %79 : vector<1x256xbf16> to vector<32x256xbf16>
    %81 = arith.mulf %76, %80 : vector<32x256xbf16>
    %82 = arith.truncf %74 : vector<32x256xf32> to vector<32x256xbf16>
    %c0_49 = arith.constant 0 : index
    %c0_50 = arith.constant 0 : index
    %83 = vector.load %arg2[%c0_49, %c0_50] : memref<4x256xbf16, #tpu.memory_space<vmem>>, vector<1x256xbf16>
    %84 = vector.broadcast %83 : vector<1x256xbf16> to vector<32x256xbf16>
    %85 = arith.mulf %82, %84 : vector<32x256xbf16>
    %c255_i32_51 = arith.constant 255 : i32
    %86 = tpu.dynamic_rotate %74 by %c255_i32_51 dim 1 : vector<32x256xf32>, i32 -> vector<32x256xf32>
    %87 = arith.truncf %86 : vector<32x256xf32> to vector<32x256xbf16>
    %c0_52 = arith.constant 0 : index
    %c0_53 = arith.constant 0 : index
    %88 = vector.load %arg2[%c0_52, %c0_53] : memref<4x256xbf16, #tpu.memory_space<vmem>>, vector<1x256xbf16>
    %c3_54 = arith.constant 3 : index
    %c0_55 = arith.constant 0 : index
    %89 = vector.load %arg2[%c3_54, %c0_55] : memref<4x256xbf16, #tpu.memory_space<vmem>>, vector<1x256xbf16>
    %90 = arith.mulf %88, %89 : vector<1x256xbf16>
    %91 = vector.broadcast %90 : vector<1x256xbf16> to vector<32x256xbf16>
    %92 = arith.mulf %87, %91 : vector<32x256xbf16>
    %93 = tpu.concatenate %81, %85, %92 in 0 : vector<32x256xbf16>, vector<32x256xbf16>, vector<32x256xbf16> -> vector<96x256xbf16>
    %c0_56 = arith.constant 0 : index
    %c0_57 = arith.constant 0 : index
    %c0_58 = arith.constant 0 : index
    %94 = vector.load %arg6[%c0_56, %c0_57, %c0_58] : memref<3x32x96xbf16, #tpu.memory_space<vmem>>, vector<1x32x96xbf16>
    %95 = vector.shape_cast %94 : vector<1x32x96xbf16> to vector<32x96xbf16>
    %cst_59 = arith.constant dense<0.000000e+00> : vector<32x256xf32>
    %96 = tpu.matmul %95, %93, %cst_59 {dimension_numbers = #tpu.dot_dimension_numbers<[1], [0], [0], [1], [0, 0, 1, 1], [], []>} : vector<32x96xbf16>, vector<96x256xbf16>, vector<32x256xf32> -> vector<32x256xf32>
    %c1_i32_60 = arith.constant 1 : i32
    %97 = tpu.dynamic_rotate %73 by %c1_i32_60 dim 1 : vector<32x256xf32>, i32 -> vector<32x256xf32>
    %98 = arith.truncf %97 : vector<32x256xf32> to vector<32x256xbf16>
    %c2_61 = arith.constant 2 : index
    %c0_62 = arith.constant 0 : index
    %99 = vector.load %arg2[%c2_61, %c0_62] : memref<4x256xbf16, #tpu.memory_space<vmem>>, vector<1x256xbf16>
    %100 = vector.broadcast %99 : vector<1x256xbf16> to vector<32x256xbf16>
    %101 = arith.mulf %98, %100 : vector<32x256xbf16>
    %102 = arith.truncf %73 : vector<32x256xf32> to vector<32x256xbf16>
    %c255_i32_63 = arith.constant 255 : i32
    %103 = tpu.dynamic_rotate %73 by %c255_i32_63 dim 1 : vector<32x256xf32>, i32 -> vector<32x256xf32>
    %104 = arith.truncf %103 : vector<32x256xf32> to vector<32x256xbf16>
    %c3_64 = arith.constant 3 : index
    %c0_65 = arith.constant 0 : index
    %105 = vector.load %arg2[%c3_64, %c0_65] : memref<4x256xbf16, #tpu.memory_space<vmem>>, vector<1x256xbf16>
    %106 = vector.broadcast %105 : vector<1x256xbf16> to vector<32x256xbf16>
    %107 = arith.mulf %104, %106 : vector<32x256xbf16>
    %108 = tpu.concatenate %101, %102, %107 in 0 : vector<32x256xbf16>, vector<32x256xbf16>, vector<32x256xbf16> -> vector<96x256xbf16>
    %c1_66 = arith.constant 1 : index
    %c0_67 = arith.constant 0 : index
    %c0_68 = arith.constant 0 : index
    %109 = vector.load %arg6[%c1_66, %c0_67, %c0_68] : memref<3x32x96xbf16, #tpu.memory_space<vmem>>, vector<1x32x96xbf16>
    %110 = vector.shape_cast %109 : vector<1x32x96xbf16> to vector<32x96xbf16>
    %cst_69 = arith.constant dense<0.000000e+00> : vector<32x256xf32>
    %111 = tpu.matmul %110, %108, %cst_69 {dimension_numbers = #tpu.dot_dimension_numbers<[1], [0], [0], [1], [0, 0, 1, 1], [], []>} : vector<32x96xbf16>, vector<96x256xbf16>, vector<32x256xf32> -> vector<32x256xf32>
    %112 = arith.addf %96, %111 : vector<32x256xf32>
    %c240_i32_70 = arith.constant 240 : i32
    %113 = tpu.dynamic_rotate %73 by %c240_i32_70 dim 1 : vector<32x256xf32>, i32 -> vector<32x256xf32>
    %c1_i32_71 = arith.constant 1 : i32
    %114 = tpu.dynamic_rotate %113 by %c1_i32_71 dim 1 : vector<32x256xf32>, i32 -> vector<32x256xf32>
    %115 = arith.truncf %114 : vector<32x256xf32> to vector<32x256xbf16>
    %c1_72 = arith.constant 1 : index
    %c0_73 = arith.constant 0 : index
    %116 = vector.load %arg2[%c1_72, %c0_73] : memref<4x256xbf16, #tpu.memory_space<vmem>>, vector<1x256xbf16>
    %c2_74 = arith.constant 2 : index
    %c0_75 = arith.constant 0 : index
    %117 = vector.load %arg2[%c2_74, %c0_75] : memref<4x256xbf16, #tpu.memory_space<vmem>>, vector<1x256xbf16>
    %118 = arith.mulf %116, %117 : vector<1x256xbf16>
    %119 = vector.broadcast %118 : vector<1x256xbf16> to vector<32x256xbf16>
    %120 = arith.mulf %115, %119 : vector<32x256xbf16>
    %121 = arith.truncf %113 : vector<32x256xf32> to vector<32x256xbf16>
    %c1_76 = arith.constant 1 : index
    %c0_77 = arith.constant 0 : index
    %122 = vector.load %arg2[%c1_76, %c0_77] : memref<4x256xbf16, #tpu.memory_space<vmem>>, vector<1x256xbf16>
    %123 = vector.broadcast %122 : vector<1x256xbf16> to vector<32x256xbf16>
    %124 = arith.mulf %121, %123 : vector<32x256xbf16>
    %c255_i32_78 = arith.constant 255 : i32
    %125 = tpu.dynamic_rotate %113 by %c255_i32_78 dim 1 : vector<32x256xf32>, i32 -> vector<32x256xf32>
    %126 = arith.truncf %125 : vector<32x256xf32> to vector<32x256xbf16>
    %c1_79 = arith.constant 1 : index
    %c0_80 = arith.constant 0 : index
    %127 = vector.load %arg2[%c1_79, %c0_80] : memref<4x256xbf16, #tpu.memory_space<vmem>>, vector<1x256xbf16>
    %c3_81 = arith.constant 3 : index
    %c0_82 = arith.constant 0 : index
    %128 = vector.load %arg2[%c3_81, %c0_82] : memref<4x256xbf16, #tpu.memory_space<vmem>>, vector<1x256xbf16>
    %129 = arith.mulf %127, %128 : vector<1x256xbf16>
    %130 = vector.broadcast %129 : vector<1x256xbf16> to vector<32x256xbf16>
    %131 = arith.mulf %126, %130 : vector<32x256xbf16>
    %132 = tpu.concatenate %120, %124, %131 in 0 : vector<32x256xbf16>, vector<32x256xbf16>, vector<32x256xbf16> -> vector<96x256xbf16>
    %c2_83 = arith.constant 2 : index
    %c0_84 = arith.constant 0 : index
    %c0_85 = arith.constant 0 : index
    %133 = vector.load %arg6[%c2_83, %c0_84, %c0_85] : memref<3x32x96xbf16, #tpu.memory_space<vmem>>, vector<1x32x96xbf16>
    %134 = vector.shape_cast %133 : vector<1x32x96xbf16> to vector<32x96xbf16>
    %cst_86 = arith.constant dense<0.000000e+00> : vector<32x256xf32>
    %135 = tpu.matmul %134, %132, %cst_86 {dimension_numbers = #tpu.dot_dimension_numbers<[1], [0], [0], [1], [0, 0, 1, 1], [], []>} : vector<32x96xbf16>, vector<96x256xbf16>, vector<32x256xf32> -> vector<32x256xf32>
    %136 = arith.addf %112, %135 : vector<32x256xf32>
    %c0_87 = arith.constant 0 : index
    %c0_88 = arith.constant 0 : index
    %137 = vector.load %arg7[%c0_87, %c0_88] : memref<32x1xf32, #tpu.memory_space<vmem>>, vector<32x1xf32>
    %138 = vector.broadcast %137 : vector<32x1xf32> to vector<32x256xf32>
    %139 = arith.mulf %136, %138 : vector<32x256xf32>
    %c0_89 = arith.constant 0 : index
    %c0_90 = arith.constant 0 : index
    %140 = vector.load %arg8[%c0_89, %c0_90] : memref<32x1xf32, #tpu.memory_space<vmem>>, vector<32x1xf32>
    %141 = vector.broadcast %140 : vector<32x1xf32> to vector<32x256xf32>
    %142 = arith.addf %139, %141 : vector<32x256xf32>
    %cst_91 = arith.constant 0.000000e+00 : f32
    %143 = vector.broadcast %cst_91 : f32 to vector<32x256xf32>
    %144 = arith.maximumf %142, %143 : vector<32x256xf32>
    %cst_92 = arith.constant dense<0.000000e+00> : vector<32xf32>
    %145 = vector.multi_reduction <add>, %144, %cst_92 [1] : vector<32x256xf32> to vector<32xf32>
    %146 = vector.shape_cast %145 : vector<32xf32> to vector<32x1xf32>
    %cst_93 = arith.constant 2.560000e+02 : f32
    %147 = vector.broadcast %cst_93 : f32 to vector<32x1xf32>
    %148 = arith.divf %146, %147 : vector<32x1xf32>
    %c0_94 = arith.constant 0 : index
    %c0_95 = arith.constant 0 : index
    %149 = vector.load %arg9[%c0_94, %c0_95] : memref<32x2xf32, #tpu.memory_space<vmem>>, vector<32x2xf32>
    %150 = vector.broadcast %148 : vector<32x1xf32> to vector<32x2xf32>
    %151 = arith.mulf %149, %150 : vector<32x2xf32>
    %cst_96 = arith.constant dense<0.000000e+00> : vector<2xf32>
    %152 = vector.multi_reduction <add>, %151, %cst_96 [0] : vector<32x2xf32> to vector<2xf32>
    %153 = vector.shape_cast %152 : vector<2xf32> to vector<1x2xf32>
    %c0_97 = arith.constant 0 : index
    %c0_98 = arith.constant 0 : index
    %154 = vector.load %arg10[%c0_97, %c0_98] : memref<1x2xf32, #tpu.memory_space<vmem>>, vector<1x2xf32>
    %155 = arith.addf %153, %154 : vector<1x2xf32>
    %cst_99 = arith.constant 0.000000e+00 : f32
    %156 = vector.broadcast %cst_99 : f32 to vector<1x2xf32>
    %157 = arith.maximumf %155, %156 : vector<1x2xf32>
    %c0_100 = arith.constant 0 : index
    %c0_101 = arith.constant 0 : index
    %158 = vector.load %arg11[%c0_100, %c0_101] : memref<32x2xf32, #tpu.memory_space<vmem>>, vector<32x2xf32>
    %159 = vector.broadcast %157 : vector<1x2xf32> to vector<32x2xf32>
    %160 = arith.mulf %158, %159 : vector<32x2xf32>
    %cst_102 = arith.constant dense<0.000000e+00> : vector<32xf32>
    %161 = vector.multi_reduction <add>, %160, %cst_102 [1] : vector<32x2xf32> to vector<32xf32>
    %162 = vector.shape_cast %161 : vector<32xf32> to vector<32x1xf32>
    %c0_103 = arith.constant 0 : index
    %c0_104 = arith.constant 0 : index
    %163 = vector.load %arg12[%c0_103, %c0_104] : memref<32x1xf32, #tpu.memory_space<vmem>>, vector<32x1xf32>
    %164 = arith.addf %162, %163 : vector<32x1xf32>
    %165 = arith.negf %164 : vector<32x1xf32>
    %166 = math.exp %165 : vector<32x1xf32>
    %cst_105 = arith.constant 1.000000e+00 : f32
    %167 = vector.broadcast %cst_105 : f32 to vector<32x1xf32>
    %168 = arith.addf %167, %166 : vector<32x1xf32>
    %169 = arith.divf %167, %168 : vector<32x1xf32>
    %170 = vector.broadcast %169 : vector<32x1xf32> to vector<32x256xf32>
    %171 = arith.mulf %144, %170 : vector<32x256xf32>
    %172 = vector.shape_cast %171 : vector<32x256xf32> to vector<1x32x256xf32>
    %c0_106 = arith.constant 0 : index
    %c0_107 = arith.constant 0 : index
    %c0_108 = arith.constant 0 : index
    %173 = vector.load %arg13[%c0_106, %c0_107, %c0_108] : memref<1x32x256xf32, #tpu.memory_space<vmem>>, vector<1x32x256xf32>
    tpu.vector_store %arg13[%c0_106, %c0_107, %c0_108], %172 {strides = array<i32>} : memref<1x32x256xf32, #tpu.memory_space<vmem>>, vector<1x32x256xf32>,
    return
  }
  func.func @transform_0(%arg0: i32) -> (i32, i32, i32) {
    %c0_i32 = arith.constant 0 : i32
    %c0_i32_0 = arith.constant 0 : i32
    %c0_i32_1 = arith.constant 0 : i32
    return %arg0, %c0_i32, %c0_i32_0 : i32, i32, i32
  }
  func.func @transform_1(%arg0: i32) -> (i32, i32) {
    %c0_i32 = arith.constant 0 : i32
    %c0_i32_0 = arith.constant 0 : i32
    %c0_i32_1 = arith.constant 0 : i32
    return %c0_i32, %c0_i32_0 : i32, i32
  }
  func.func @transform_2(%arg0: i32) -> (i32, i32, i32) {
    %c0_i32 = arith.constant 0 : i32
    %c0_i32_0 = arith.constant 0 : i32
    %c0_i32_1 = arith.constant 0 : i32
    %c0_i32_2 = arith.constant 0 : i32
    return %c0_i32, %c0_i32_0, %c0_i32_1 : i32, i32, i32
  }
  func.func @transform_3(%arg0: i32) -> (i32, i32) {
    %c0_i32 = arith.constant 0 : i32
    %c0_i32_0 = arith.constant 0 : i32
    %c0_i32_1 = arith.constant 0 : i32
    return %c0_i32, %c0_i32_0 : i32, i32
  }
  func.func @transform_4(%arg0: i32) -> (i32, i32) {
    %c0_i32 = arith.constant 0 : i32
    %c0_i32_0 = arith.constant 0 : i32
    %c0_i32_1 = arith.constant 0 : i32
    return %c0_i32, %c0_i32_0 : i32, i32
  }
  func.func @transform_5(%arg0: i32) -> (i32, i32, i32) {
    %c0_i32 = arith.constant 0 : i32
    %c0_i32_0 = arith.constant 0 : i32
    %c0_i32_1 = arith.constant 0 : i32
    %c0_i32_2 = arith.constant 0 : i32
    return %c0_i32, %c0_i32_0, %c0_i32_1 : i32, i32, i32
  }
  func.func @transform_6(%arg0: i32) -> (i32, i32) {
    %c0_i32 = arith.constant 0 : i32
    %c0_i32_0 = arith.constant 0 : i32
    %c0_i32_1 = arith.constant 0 : i32
    return %c0_i32, %c0_i32_0 : i32, i32
  }
  func.func @transform_7(%arg0: i32) -> (i32, i32) {
    %c0_i32 = arith.constant 0 : i32
    %c0_i32_0 = arith.constant 0 : i32
    %c0_i32_1 = arith.constant 0 : i32
    return %c0_i32, %c0_i32_0 : i32, i32
  }
  func.func @transform_8(%arg0: i32) -> (i32, i32) {
    %c0_i32 = arith.constant 0 : i32
    %c0_i32_0 = arith.constant 0 : i32
    %c0_i32_1 = arith.constant 0 : i32
    return %c0_i32, %c0_i32_0 : i32, i32
  }
  func.func @transform_9(%arg0: i32) -> (i32, i32) {
    %c0_i32 = arith.constant 0 : i32
    %c0_i32_0 = arith.constant 0 : i32
    %c0_i32_1 = arith.constant 0 : i32
    return %c0_i32, %c0_i32_0 : i32, i32
  }
  func.func @transform_10(%arg0: i32) -> (i32, i32) {
    %c0_i32 = arith.constant 0 : i32
    %c0_i32_0 = arith.constant 0 : i32
    %c0_i32_1 = arith.constant 0 : i32
    return %c0_i32, %c0_i32_0 : i32, i32
  }
  func.func @transform_11(%arg0: i32) -> (i32, i32) {
    %c0_i32 = arith.constant 0 : i32
    %c0_i32_0 = arith.constant 0 : i32
    %c0_i32_1 = arith.constant 0 : i32
    return %c0_i32, %c0_i32_0 : i32, i32
  }
  func.func @transform_12(%arg0: i32) -> (i32, i32, i32) {
    %c0_i32 = arith.constant 0 : i32
    %c0_i32_0 = arith.constant 0 : i32
    %c0_i32_1 = arith.constant 0 : i32
    return %arg0, %c0_i32, %c0_i32_0 : i32, i32, i32
  }
}

</mosaic_0001>

<bundles_post_ra>
// kernel: _conv_block_forward.1
= control target key start
LH: loop header
LB: loop body
LE: loop exit
PB: predicated region body
PF: predicated region fallthrough
CT: control target
= control target key end

     0   :  { %s2290_s21 = smov 0   ;;  %s3089_s0 = inlined_call_operand.vmem [shape: bf16[2,16,256], index: 0, kind: input, shape index: {}]   ;;  %s3090_s1 = inlined_call_operand.vmem [shape: bf16[4,256], index: 1, kind: input, shape index: {}]   ;;  %s3091_s2 = inlined_call_operand.vmem [shape: bf16[3,32,48], index: 2, kind: input, shape index: {}]   ;;  %s3092_s3 = inlined_call_operand.vmem [shape: f32[32,1], index: 3, kind: input, shape index: {}]   ;;  %s3093_s4 = inlined_call_operand.vmem [shape: f32[32,1], index: 4, kind: input, shape index: {}]   ;;  %s3094_s5 = inlined_call_operand.vmem [shape: bf16[3,32,96], index: 5, kind: input, shape index: {}]   ;;  %s3095_s6 = inlined_call_operand.vmem [shape: f32[32,1], index: 6, kind: input, shape index: {}]   ;;  %s3096_s7 = inlined_call_operand.vmem [shape: f32[32,1], index: 7, kind: input, shape index: {}]   ;;  %s3097_s8 = inlined_call_operand.vmem [shape: f32[32,2], index: 8, kind: input, shape index: {}]   ;;  %s3098_s9 = inlined_call_operand.vmem [shape: f32[1,2], index: 9, kind: input, shape index: {}]   ;;  %s3099_s10 = inlined_call_operand.vmem [shape: f32[32,2], index: 10, kind: input, shape index: {}]   ;;  %s3100_s11 = inlined_call_operand.vmem [shape: f32[32,1], index: 11, kind: input, shape index: {}]   ;;  %s3101_s12 = inlined_call_operand.vmem [shape: f32[2,32,256], index: 12, kind: output, shape index: {}]  }
   0x1 LB: > { %s1820_s22 = sadd.s32 4294967295, %s2217_s21   ;;  %p1824_p0 = scmp.ge.s32.totalorder %s2217_s21, 1  ;;  %s2217_s21 = sphi %s2290_s21, %s22_s21  }
   0x2   : > { %p362_p1 = scmp.lt.s32.totalorder %s2217_s21, 3 }
   0x4   : > { %p363_p2 = pnand %p1824_p0, %p362_p1 }
   0x5   : > { %p404_p3 = scmp.lt.s32.totalorder (!%p363_p2), %s1820_s22, 1  ;;  %s2219_s27 = smov (!%p363_p2), 16   ;;  %v429_v10 = vlaneseq (!%p363_p2)  ;;  %v2223_v11 = vmov (!%p363_p2), 1983009808   ;;  %v2329_v15 = vld [vmem:[%s3090_s1] sm:$0xa] (!%p363_p2) }
   0x6   : > { %366 = sbr.rel (%p363_p2) target bundleno = 1513 (0x5e9), region = 68  ;;  %s2220_s28 = smov (!%p363_p2), 112   ;;  %v460_v12 = vunpack.c.l.s4 (!%p363_p2), %v2223_v11  ;;  %v2224_v22 = vmov (!%p363_p2), 0   ;;  %vm654_vm4 = vcmask (!%p363_p2), 392192   ;;  %vm1252_vm5 = vcmask (!%p363_p2), 785408  }
   0x7   : > { %s2221_s29 = smov (!%p363_p2), 1   ;;  %s2222_s30 = smov (!%p363_p2), 127   ;;  %v2324_v14 = vshrl.u32 (!%p363_p2), %v429_v10, 7  ;;  %v2338_v18 = vand.u32 (!%p363_p2), 127, %v429_v10  ;;  %693 = vmatprep.mubr.bf16.mxu0 (!%p363_p2), %v2224_v22  ;;  %2020 = vset.pattern.permute.xlu1 (!%p363_p2), %v2224_v22  ;;  %vm1656_vm6 = vcmask (!%p363_p2), 15360  }
   0x8   : > { %v461_v13 = vunpack.c.0.s8 (!%p363_p2), %v460_v12  ;;  %2019 = vset.pattern.permute.xlu0 (!%p363_p2), %v2224_v22  ;;  %1291 = vmatprep.mubr.bf16.mxu1 (!%p363_p2), %v2224_v22 }
   0x9   : > { %vm431_vm0 = vcmp.lt.s32.totalorder (!%p363_p2), %v2338_v18, 16  ;;  %v2348_v23 = vsub.s32 (!%p363_p2), 1, %v2324_v14  ;;  %vm444_vm1 = vcmp.lt.s32.totalorder (!%p363_p2), %v2338_v18, 1  ;;  %vm518_vm2 = vcmp.lt.s32.totalorder (!%p363_p2), %v2338_v18, 127 }
   0xa   : > { %v2332_v16 = vsub.s32 (!%p363_p2), %v461_v13, %v2324_v14  ;;  %vm791_vm3 = vcmp.lt.s32.totalorder (!%p363_p2), %v2338_v18, 112 }
   0xc   : > { %v2336_v17 = vrot.slane (!%p363_p2), %v2329_v15, %v2332_v16 }
   0xd   : > { %s3109_s22 = smov (!%p404_p3, %s1820_s22), 1 }
   0xe   : > { %s1879_s23 = sshll.u32 %s3109_s22, 4  ;;  %v582_v19 = vcombine.high %v2336_v17, %v2336_v17  ;;  %v584_v36 = vpack.i.b16 %v2336_v17, %v2336_v17  ;;  %v613_v54 = vshrl.u32 %v2336_v17, 16  ;;  %s1880_s13 = sshll.u32 %s3109_s22, 6 }
   0xf   : > { %s408_s26 = scalar_lea.vmem %s3089_s0, %s1879_s23  ;;  %s413_s16 = scalar_lea.vmem %s3101_s12, %s1880_s13 }
  0x10   : > { %v2304_v0 = vld [vmem:[%s408_s26] sm:$0xff]  ;;  %v2306_v1 = vld [vmem:[%s408_s26 + $0x8] sm:$0xff]  ;;  %v591_v24 = vpack.i.b16 %v582_v19, %v582_v19  ;;  %v620_v25 = vshrl.u32 %v582_v19, 16  ;;  %v2420_v12 = vrot.slane %v584_v36, %v2348_v23  ;;  %v999_v36 = vld [vmem:[%s3092_s3 + $0x10] sm:$0xff] }
  0x11   : > { %v417_v2 = vunpack.c.l.bf16 %v2304_v0  ;;  %v419_v3 = vunpack.c.l.bf16 %v2306_v1  ;;  %v418_v4 = vunpack.c.h.bf16 %v2304_v0  ;;  %v420_v5 = vunpack.c.h.bf16 %v2306_v1 }
  0x12   : > { %v1831_v8 = vcombine.high %v2304_v0, %v2306_v1  ;;  %v1830_v9 = vcombine.low %v2304_v0, %v2306_v1  ;;  %v2378_v46 = vrot.slane %v591_v24, %v2348_v23  ;;  %v621_v50 = vpack.i.b16 %v620_v25, %v620_v25  ;;  %v997_v0 = vld [vmem:[%s3092_s3] sm:$0xff]  ;;  %v998_v1 = vld [vmem:[%s3092_s3 + $0x8] sm:$0xff] }
  0x13   : > { %v1939_v6 = vpack.i.bf16 %v419_v3, %v417_v2  ;;  %v1944_v7 = vpack.i.bf16 %v420_v5, %v418_v4 }
  0x14   : > { %v2425_v19 = vrot.slane %v621_v50, %v2348_v23  ;;  %v811_v50 = vshll.u32 %v2329_v15, 16 }
  0x15   : > { %1940 = vrot.lane.b32.xlu0 %v1939_v6, %s2219_s27  ;;  %1950 = vrot.lane.b32.xlu1 %v1939_v6, %s2220_s28 }
  0x19   : > { %1945 = vrot.lane.b32.xlu0 %v1944_v7, %s2219_s27  ;;  %1955 = vrot.lane.b32.xlu1 %v1944_v7, %s2220_s28 }
  0x1d   : > { %1965 = vrot.lane.b32.xlu1 %v1944_v7, %s2221_s29  ;;  %1960 = vrot.lane.b32.xlu0 %v1939_v6, %s2221_s29 }
  0x21   : > { %1975 = vrot.lane.b32.xlu1 %v1944_v7, %s2222_s30  ;;  %1970 = vrot.lane.b32.xlu0 %v1939_v6, %s2222_s30 }
  0x87   : > { %v1941_v20 = vpop.permute.xlu0 %1940  ;;  %v1951_v21 = vpop.permute.xlu1 %1950 }
  0x88   : > { %v1943_v26 = vunpack.i.h.bf16 %v1941_v20  ;;  %v1942_v27 = vunpack.i.l.bf16 %v1941_v20  ;;  %v1953_v29 = vunpack.i.h.bf16 %v1951_v21  ;;  %v1952_v30 = vunpack.i.l.bf16 %v1951_v21 }
  0x89   : > { %v614_v20 = vpack.i.b16 %v613_v54, %v613_v54 }
  0x8b   : > { %v1946_v28 = vpop.permute.xlu0 %1945  ;;  %v1956_v31 = vpop.permute.xlu1 %1955 }
  0x8c   : > { %v1948_v32 = vunpack.i.h.bf16 %v1946_v28  ;;  %v1947_v33 = vunpack.i.l.bf16 %v1946_v28  ;;  %v1958_v34 = vunpack.i.h.bf16 %v1956_v31  ;;  %v1957_v35 = vunpack.i.l.bf16 %v1956_v31 }
  0x8d   : > { %v2438_v31 = vrot.slane %v614_v20, %v2348_v23  ;;  %v2183_v23 = vld [vmem:[%s3091_s2 + $0x10] sm:$0xff]  }
  0x8e   : > { %v2357_v37 = vsel %vm431_vm0, %v1947_v33, %v1942_v27  ;;  %v2361_v38 = vsel %vm431_vm0, %v1948_v32, %v1943_v26  ;;  %v2365_v39 = vsel %vm431_vm0, %v1942_v27, %v1947_v33  ;;  %v2369_v40 = vsel %vm431_vm0, %v1943_v26, %v1948_v32 }
  0x8f   : > { %v1979_v41 = vpack.i.bf16 %v2361_v38, %v2357_v37  ;;  %v483_v42 = vpack.c.bf16 %v2361_v38, %v2357_v37  ;;  %v1984_v43 = vpack.i.bf16 %v2369_v40, %v2365_v39  ;;  %v1966_v44 = vpop.permute.xlu1 %1965  ;;  %v1961_v45 = vpop.permute.xlu0 %1960  ;;  %v2382_v47 = vsel %vm791_vm3, %v1952_v30, %v1957_v35 }
  0x90   : > { %v2386_v48 = vsel %vm791_vm3, %v1953_v29, %v1958_v34  ;;  %v2390_v49 = vsel %vm791_vm3, %v1957_v35, %v1952_v30  ;;  %v2398_v52 = vsel %vm791_vm3, %v1958_v34, %v1953_v29  ;;  %v1968_v53 = vunpack.i.h.bf16 %v1966_v44  ;;  %v1029_v34 = vld [vmem:[%s3093_s4] sm:$0xff]  ;;  %v1000_v35 = vld [vmem:[%s3092_s3 + $0x18] sm:$0xff] }
  0x91   : > { %1980 = vrot.lane.b32.xlu0 %v1979_v41, %s2221_s29  ;;  %1985 = vrot.lane.b32.xlu1 %v1984_v43, %s2221_s29  ;;  %v844_v51 = vpack.c.bf16 %v2386_v48, %v2382_v47  ;;  %v1999_v55 = vpack.i.bf16 %v2386_v48, %v2382_v47  ;;  %v1967_v56 = vunpack.i.l.bf16 %v1966_v44  ;;  %v2004_v57 = vpack.i.bf16 %v2398_v52, %v2390_v49  ;;  %v2187_v47 = vld [vmem:[%s3091_s2 + $0x20] sm:$0xff]   ;;  %v2188_v48 = vld [vmem:[%s3091_s2 + $0x28] sm:$0xff]  }
  0x92   : > { %v1963_v58 = vunpack.i.h.bf16 %v1961_v45  ;;  %v1962_v59 = vunpack.i.l.bf16 %v1961_v45  ;;  %v484_v62 = vpack.c.bf16 %v2369_v40, %v2365_v39  ;;  %v845_v29 = vpack.c.bf16 %v2398_v52, %v2390_v49 }
  0x93   : > { %v1976_v60 = vpop.permute.xlu1 %1975  ;;  %v1971_v61 = vpop.permute.xlu0 %1970  ;;  %v454_v44 = vrot.slane %v2329_v15, 7 }
  0x94   : > { %v1978_v63 = vunpack.i.h.bf16 %v1976_v60  ;;  %v1977_v2 = vunpack.i.l.bf16 %v1976_v60  ;;  %v1973_v3 = vunpack.i.h.bf16 %v1971_v61  ;;  %v1972_v4 = vunpack.i.l.bf16 %v1971_v61 }
  0x95   : > { %1990 = vrot.lane.b32.xlu0 %v1979_v41, %s2222_s30  ;;  %1995 = vrot.lane.b32.xlu1 %v1984_v43, %s2222_s30  ;;  %v569_v5 = vsel %vm444_vm1, %v1962_v59, %v1967_v56  ;;  %v570_v6 = vsel %vm444_vm1, %v1963_v58, %v1968_v53  ;;  %v571_v7 = vsel %vm444_vm1, %v1967_v56, %v1962_v59  ;;  %v1032_v41 = vld [vmem:[%s3093_s4 + $0x18] sm:$0xff]  ;;  %v1031_v43 = vld [vmem:[%s3093_s4 + $0x10] sm:$0xff]  ;;  %v455_v45 = vrot.slane %v454_v44, 2 }
  0x96   : > { %v610_v10 = vsel %vm518_vm2, %v1978_v63, %v1973_v3  ;;  %v609_v11 = vsel %vm518_vm2, %v1977_v2, %v1972_v4  ;;  %v574_v13 = vpack.c.bf16 %v570_v6, %v569_v5  ;;  %v572_v17 = vsel %vm444_vm1, %v1968_v53, %v1963_v58  ;;  %v451_v53 = vld [vmem:[%s3090_s1] sm:$0x5] }
  0x97   : > { %v608_v21 = vsel %vm518_vm2, %v1973_v3, %v1978_v63  ;;  %v573_v24 = vpack.c.bf16 %v572_v17, %v571_v7  ;;  %v607_v25 = vsel %vm518_vm2, %v1972_v4, %v1977_v2  ;;  %v612_v27 = vpack.c.bf16 %v610_v10, %v609_v11  ;;  %v810_v56 = vld [vmem:[%s3090_s1] sm:$0x5] }
  0x98   : > { %v598_v26 = vmul.bf16 %v2378_v46, %v574_v13  ;;  %v611_v30 = vpack.c.bf16 %v608_v21, %v607_v25  ;;  %v457_v54 = vmul.bf16 %v455_v45, %v451_v53  ;;  %v492_v58 = vrot.slane %v451_v53, %v2332_v16 }
  0x99   : > { %2000 = vrot.lane.b32.xlu0 %v1999_v55, %s2221_s29  ;;  %2005 = vrot.lane.b32.xlu1 %v2004_v57, %s2221_s29  ;;  %v597_v28 = vmul.bf16 %v2420_v12, %v573_v24  ;;  %v628_v32 = vmul.bf16 %v2425_v19, %v612_v27  ;;  %v2496_v61 = vrot.slane %v810_v56, %v2332_v16  ;;  %v2501_v5 = vsub.s32 0, %v2324_v14 }
  0x9a   : > { %661 = vmatprep.subr.bf16.mxu0 %v598_v26  ;;  %v627_v33 = vmul.bf16 %v2438_v31, %v611_v30  ;;  %v465_v59 = vrot.slane %v457_v54, %v2332_v16  ;;  %v493_v2 = vcombine.high %v492_v58, %v492_v58  ;;  %v495_v6 = vpack.i.b16 %v492_v58, %v492_v58 }
  0x9b   : > { %662 = vmatpush1.bf16.msra.mxu0 %v597_v28  ;;  %v887_v25 = vmul.bf16 %v810_v56, %v455_v45  ;;  %v856_v14 = vshrl.u32 %v2496_v61, 16 }
  0x9c   : > { %663 = vmatprep.subr.bf16.mxu0 %v1831_v8  ;;  %v2184_v8 = vld [vmem:[%s3091_s2 + $0x18] sm:$0xff]   ;;  %v466_v3 = vcombine.high %v465_v59, %v465_v59  ;;  %v502_v10 = vpack.i.b16 %v493_v2, %v493_v2  ;;  %v468_v13 = vpack.i.b16 %v465_v59, %v465_v59  ;;  %v2508_v21 = vrot.slane %v495_v6, %v2501_v5 }
  0x9d   : > { %2010 = vrot.lane.b32.xlu0 %v1999_v55, %s2222_s30  ;;  %2015 = vrot.lane.b32.xlu1 %v2004_v57, %s2222_s30  ;;  %v526_v55 = vshrl.u32 %v2329_v15, 16  ;;  %v1844_v57 = vrot.slane %v811_v50, 9  ;;  %v854_v15 = vcombine.high %v2496_v61, %v2496_v61 }
  0x9e   : > { %v475_v11 = vpack.i.b16 %v466_v3, %v466_v3  ;;  %v2511_v26 = vrot.slane %v502_v10, %v2501_v5 }
  0x9f   : > { %664 = vmatpush1.bf16.msra.mxu0 %v1830_v9  ;;  %v1030_v9 = vld [vmem:[%s3093_s4 + $0x8] sm:$0xff]  ;;  %v1829_v60 = vrot.slane %v526_v55, 9  ;;  %v816_v63 = vmul.bf16 %v1844_v57, %v810_v56  ;;  %v2505_v20 = vshrl.u32 %v854_v15, 16 }
  0xa0   : > { %665 = vmatprep.subr.bf16.mxu0 %v628_v32  ;;  %v2515_v30 = vrot.slane %v475_v11, %v2501_v5  ;;  %v2518_v32 = vrot.slane %v468_v13, %v2501_v5  ;;  %v509_v11 = vmul.bf16 %v2511_v26, %v484_v62 }
  0xa1   : > { %1003 = vperm.xlu0 %2019, %v997_v0   ;;  %1008 = vperm.xlu1 %2020, %v998_v1   ;;  %v531_v4 = vmul.bf16 %v1829_v60, %v451_v53  ;;  %v824_v7 = vrot.slane %v816_v63, %v2332_v16 }
  0xa3   : > { %666 = vmatpush1.bf16.msra.mxu0 %v627_v33  ;;  %v539_v17 = vrot.slane %v531_v4, %v2332_v16  ;;  %v825_v24 = vcombine.high %v824_v7, %v824_v7  ;;  %v827_v55 = vshrl.u32 %v824_v7, 16 }
  0xa5   : > { %1040 = vperm.xlu0 %2019, %v1030_v9   ;;  %1035 = vperm.xlu1 %2020, %v1029_v34   ;;  %v540_v33 = vcombine.high %v539_v17, %v539_v17  ;;  %v508_v34 = vmul.bf16 %v2508_v21, %v483_v42 }
  0xa6   : > { %1838 = vmatmul.mubr.msk.bf16.vlgmr.msra.gmra.mrb[0].mxu0 %vm654_vm4, %v2183_v23  ;;  %v865_v23 = vpack.i.b16 %v2505_v20, %v2505_v20 }
  0xa7   : > { %703 = vmatprep.mubr.bf16.mxu0 %v2224_v22  ;;  %v549_v54 = vpack.i.b16 %v540_v33, %v540_v33 }
  0xa9   : > { %1018 = vperm.xlu0 %2019, %v1000_v35   ;;  %1013 = vperm.xlu1 %2020, %v999_v36   ;;  %v542_v35 = vpack.i.b16 %v539_v17, %v539_v17  ;;  %v835_v36 = vshrl.u32 %v825_v24, 16  ;;  %v2554_v17 = vrot.slane %v549_v54, %v2501_v5  ;;  %v828_v24 = vpack.i.b16 %v827_v55, %v827_v55 }
  0xab   : > { %v836_v63 = vpack.i.b16 %v835_v36, %v835_v36 }
  0xad   : > { %1050 = vperm.xlu0 %2019, %v1032_v41   ;;  %1045 = vperm.xlu1 %2020, %v1031_v43   ;;  %v2527_v41 = vrot.slane %v887_v25, %v2332_v16 }
  0xae   : > { %1839 = vmatmul.mubr.msk.bf16.gmra.mrb[4].mxu0 %vm654_vm4, %v2184_v8 }
  0xaf   : > { %762 = vmatprep.mubr.bf16.mxu0 %v2224_v22  ;;  %v896_v2 = vcombine.high %v2527_v41, %v2527_v41 }
  0xb1   : > { %v906_v39 = vshrl.u32 %v896_v2, 16 }
 0x103   : > { %v1981_v27 = vpop.permute.xlu0 %1980  ;;  %v1986_v28 = vpop.permute.xlu1 %1985 }
 0x104   : > { %v1983_v8 = vunpack.i.h.bf16 %v1981_v27  ;;  %v1982_v0 = vunpack.i.l.bf16 %v1981_v27  ;;  %v1988_v1 = vunpack.i.h.bf16 %v1986_v28  ;;  %v1987_v9 = vunpack.i.l.bf16 %v1986_v28 }
 0x106   : > { %v446_v43 = vsel %vm444_vm1, %v1983_v8, %v1988_v1  ;;  %v448_v44 = vsel %vm444_vm1, %v1988_v1, %v1983_v8  ;;  %v445_v45 = vsel %vm444_vm1, %v1982_v0, %v1987_v9  ;;  %v447_v50 = vsel %vm444_vm1, %v1987_v9, %v1982_v0 }
 0x107   : > { %v449_v37 = vpack.c.bf16 %v448_v44, %v447_v50  ;;  %v1991_v38 = vpop.permute.xlu0 %1990  ;;  %v1996_v42 = vpop.permute.xlu1 %1995  ;;  %v450_v53 = vpack.c.bf16 %v446_v43, %v445_v45  ;;  %v2557_v0 = vrot.slane %v542_v35, %v2501_v5  ;;  %v2560_v1 = vrot.slane %v836_v63, %v2501_v5 }
 0x108   : > { %v1993_v16 = vunpack.i.h.bf16 %v1991_v38  ;;  %v1992_v56 = vunpack.i.l.bf16 %v1991_v38  ;;  %v1998_v57 = vunpack.i.h.bf16 %v1996_v42  ;;  %v1997_v58 = vunpack.i.l.bf16 %v1996_v42 }
 0x109   : > { %v482_v59 = vmul.bf16 %v2515_v30, %v450_v53  ;;  %v481_v60 = vmul.bf16 %v2518_v32, %v449_v37  ;;  %v2572_v37 = vrot.slane %v828_v24, %v2501_v5 }
 0x10a   : > { %v520_v3 = vsel %vm518_vm2, %v1993_v16, %v1998_v57  ;;  %v522_v4 = vsel %vm518_vm2, %v1998_v57, %v1993_v16  ;;  %v519_v15 = vsel %vm518_vm2, %v1992_v56, %v1997_v58  ;;  %v521_v6 = vsel %vm518_vm2, %v1997_v58, %v1992_v56 }
 0x10b   : > { %v2001_v7 = vpop.permute.xlu0 %2000  ;;  %v2006_v10 = vpop.permute.xlu1 %2005  ;;  %730 = vmatprep.subr.bf16.mxu0 %v482_v59  ;;  %v524_v13 = vpack.c.bf16 %v522_v4, %v521_v6  ;;  %v523_v8 = vpack.c.bf16 %v520_v3, %v519_v15  ;;  %v2580_v56 = vrot.slane %v865_v23, %v2501_v5  ;;  %v857_v57 = vpack.i.b16 %v856_v14, %v856_v14  ;;  %v2186_v6 = vld [vmem:[%s3091_s2 + $0x8] sm:$0xff]  }
 0x10c   : > { %v2003_v25 = vunpack.i.h.bf16 %v2001_v7  ;;  %v2002_v27 = vunpack.i.l.bf16 %v2001_v7  ;;  %v2008_v28 = vunpack.i.h.bf16 %v2006_v10  ;;  %v2007_v33 = vunpack.i.l.bf16 %v2006_v10  ;;  %731 = vmatpush1.bf16.msra.mxu0 %v481_v60 }
 0x10d   : > { %732 = vmatprep.subr.bf16.mxu0 %v509_v11  ;;  %v556_v45 = vmul.bf16 %v2554_v17, %v524_v13  ;;  %v555_v16 = vmul.bf16 %v2557_v0, %v523_v8  ;;  %v898_v58 = vshrl.u32 %v2527_v41, 16  ;;  %v907_v59 = vpack.i.b16 %v906_v39, %v906_v39 }
 0x10e   : > { %v805_v40 = vsel %vm444_vm1, %v2003_v25, %v2008_v28  ;;  %v807_v62 = vsel %vm444_vm1, %v2008_v28, %v2003_v25  ;;  %v804_v9 = vsel %vm444_vm1, %v2002_v27, %v2007_v33  ;;  %v806_v36 = vsel %vm444_vm1, %v2007_v33, %v2002_v27 }
 0x10f   : > { %v808_v43 = vpack.c.bf16 %v807_v62, %v806_v36  ;;  %v2011_v44 = vpop.permute.xlu0 %2010  ;;  %v2016_v35 = vpop.permute.xlu1 %2015  ;;  %v809_v50 = vpack.c.bf16 %v805_v40, %v804_v9  ;;  %v872_v61 = vmul.bf16 %v2580_v56, %v845_v29  ;;  %v2599_v14 = vrot.slane %v857_v57, %v2501_v5 }
 0x110   : > { %v2013_v38 = vunpack.i.h.bf16 %v2011_v44  ;;  %v2012_v42 = vunpack.i.l.bf16 %v2011_v44  ;;  %v2018_v53 = vunpack.i.h.bf16 %v2016_v35  ;;  %v2017_v54 = vunpack.i.l.bf16 %v2016_v35  ;;  %733 = vmatpush1.bf16.msra.mxu0 %v508_v34  ;;  %v2185_v34 = vld [vmem:[%s3091_s2] sm:$0xff]  }
 0x111   : > { %734 = vmatprep.subr.bf16.mxu0 %v556_v45  ;;  %v843_v55 = vmul.bf16 %v2560_v1, %v809_v50  ;;  %v842_v20 = vmul.bf16 %v2572_v37, %v808_v43  ;;  %v899_v23 = vpack.i.b16 %v898_v58, %v898_v58  ;;  %v2607_v4 = vrot.slane %v907_v59, %v2501_v5 }
 0x112   : > { %v884_v60 = vsel %vm518_vm2, %v2018_v53, %v2013_v38  ;;  %v883_v63 = vsel %vm518_vm2, %v2017_v54, %v2012_v42  ;;  %v882_v41 = vsel %vm518_vm2, %v2013_v38, %v2018_v53  ;;  %v881_v2 = vsel %vm518_vm2, %v2012_v42, %v2017_v54 }
 0x113   : > { %v886_v3 = vpack.c.bf16 %v884_v60, %v883_v63  ;;  %v885_v49 = vpack.c.bf16 %v882_v41, %v881_v2  ;;  %v871_v52 = vmul.bf16 %v2599_v14, %v844_v51  ;;  %v2615_v29 = vrot.slane %v899_v23, %v2501_v5 }
 0x114   : > { %735 = vmatpush1.bf16.msra.mxu0 %v555_v16 }
 0x115   : > { %936 = vmatprep.subr.bf16.mxu0 %v843_v55  ;;  %v914_v15 = vmul.bf16 %v2607_v4, %v886_v3  ;;  %v913_v7 = vmul.bf16 %v2615_v29, %v885_v49 }
 0x117   : > { %1842 = vmatmul.mubr.msk.bf16.vlgmr.msra.gmra.mrb[0].mxu0 %vm654_vm4, %v2185_v34 }
 0x118   : > { %937 = vmatpush1.bf16.msra.mxu0 %v842_v20  ;;  %772 = vmatprep.mubr.bf16.mxu0 %v2224_v22 }
 0x119   : > { %938 = vmatprep.subr.bf16.mxu0 %v872_v61 }
 0x11c   : > { %939 = vmatpush1.bf16.msra.mxu0 %v871_v52 }
 0x11d   : > { %940 = vmatprep.subr.bf16.mxu0 %v914_v15 }
 0x11f   : > { %1843 = vmatmul.mubr.msk.bf16.gmra.mrb[4].mxu0 %vm654_vm4, %v2186_v6 }
 0x120   : > { %941 = vmatpush1.bf16.msra.mxu0 %v913_v7  ;;  %968 = vmatprep.mubr.bf16.mxu0 %v2224_v22  ;;  %v1009_v51 = vpop.permute.xlu1 %1008  ;;  %v1004_v10 = vpop.permute.xlu0 %1003 }
 0x124   : > { %v1036_v11 = vpop.permute.xlu1 %1035  ;;  %v1041_v13 = vpop.permute.xlu0 %1040 }
 0x127   : > { %1851 = vmatmul.mubr.msk.bf16.vlgmr.msra.gmra.mrb[0].mxu0 %vm654_vm4, %v2187_v47 }
 0x128   : > { %978 = vmatprep.mubr.bf16.mxu0 %v2224_v22  ;;  %v1014_v9 = vpop.permute.xlu1 %1013  ;;  %v1019_v44 = vpop.permute.xlu0 %1018 }
 0x12c   : > { %v1046_v57 = vpop.permute.xlu1 %1045  ;;  %v1051_v61 = vpop.permute.xlu0 %1050 }
 0x12f   : > { %1852 = vmatmul.mubr.msk.bf16.gmra.mrb[4].mxu0 %vm654_vm4, %v2188_v48 }
 0x130   : > { %1530 = vmatprep.mubr.bf16.mxu0 %v2224_v22 }
 0x1fa   : > { %v970_v24 = vpop.f32.mrb[0].mxu0 }
 0x1fb   : > { %v1021_v25 = vmul.f32 %v1004_v10, %v970_v24  ;;  %v972_v27 = vpop.f32.mrb[1].mxu0 }
 0x1fc   : > { %v1022_v28 = vmul.f32 %v1004_v10, %v972_v27  ;;  %v974_v33 = vpop.f32.mrb[2].mxu0 }
 0x1fd   : > { %v1053_v8 = vadd.f32 %v1036_v11, %v1021_v25  ;;  %v1023_v39 = vmul.f32 %v1009_v51, %v974_v33  ;;  %v976_v40 = vpop.f32.mrb[3].mxu0 }
 0x1fe   : > { %v1054_v62 = vadd.f32 %v1036_v11, %v1022_v28  ;;  %v1024_v36 = vmul.f32 %v1009_v51, %v976_v40 }
 0x1ff   : > { %v1055_v43 = vadd.f32 %v1041_v13, %v1023_v39  ;;  %v1061_v45 = vmax.f32 %v1053_v8, 0.0 }
 0x200   : > { %v1056_v35 = vadd.f32 %v1041_v13, %v1024_v36  ;;  %v1062_v38 = vmax.f32 %v1054_v62, 0.0 }
 0x201   : > { %v1063_v50 = vmax.f32 %v1055_v43, 0.0 }
 0x202   : > { %v1064_v42 = vmax.f32 %v1056_v35, 0.0  ;;  %v980_v53 = vpop.f32.mrb[4].mxu0 }
 0x203   : > { %v1025_v54 = vmul.f32 %v1014_v9, %v980_v53  ;;  %v982_v55 = vpop.f32.mrb[5].mxu0  ;;  %v2021_v16 = vpack.i.bf16 %v1063_v50, %v1061_v45  ;;  %v2638_v3 = vpack.c.bf16 %v1063_v50, %v1061_v45 }
 0x204   : > { %v1026_v58 = vmul.f32 %v1014_v9, %v982_v55  ;;  %v984_v34 = vpop.f32.mrb[6].mxu0  ;;  %v2026_v59 = vpack.i.bf16 %v1064_v42, %v1062_v38  ;;  %v2636_v2 = vpack.c.bf16 %v1064_v42, %v1062_v38 }
 0x205   : > { %v1057_v60 = vadd.f32 %v1046_v57, %v1025_v54  ;;  %v1027_v63 = vmul.f32 %v1019_v44, %v984_v34  ;;  %2022 = vrot.lane.b32.xlu1 %v2021_v16, %s2219_s27  ;;  %v986_v20 = vpop.f32.mrb[7].mxu0 }
 0x206   : > { %v1058_v23 = vadd.f32 %v1046_v57, %v1026_v58  ;;  %v1028_v41 = vmul.f32 %v1019_v44, %v986_v20  ;;  %2027 = vrot.lane.b32.xlu0 %v2026_v59, %s2219_s27 }
 0x207   : > { %v1059_v49 = vadd.f32 %v1051_v61, %v1027_v63  ;;  %v1065_v15 = vmax.f32 %v1057_v60, 0.0 }
 0x208   : > { %v1060_v52 = vadd.f32 %v1051_v61, %v1028_v41  ;;  %v1066_v7 = vmax.f32 %v1058_v23, 0.0 }
 0x209   : > { %v1067_v6 = vmax.f32 %v1059_v49, 0.0 }
 0x20a   : > { %v1068_v47 = vmax.f32 %v1060_v52, 0.0 }
 0x20b   : > { %v2031_v48 = vpack.i.bf16 %v1067_v6, %v1065_v15  ;;  %v2643_v11 = vpack.c.bf16 %v1067_v6, %v1065_v15 }
 0x20c   : > { %v2036_v51 = vpack.i.bf16 %v1068_v47, %v1066_v7  ;;  %v2641_v10 = vpack.c.bf16 %v1068_v47, %v1066_v7 }
 0x20d   : > { %2032 = vrot.lane.b32.xlu1 %v2031_v48, %s2219_s27 }
 0x20e   : > { %2037 = vrot.lane.b32.xlu0 %v2036_v51, %s2219_s27 }
 0x211   : > { %2042 = vrot.lane.b32.xlu1 %v2021_v16, %s2220_s28 }
 0x212   : > { %2047 = vrot.lane.b32.xlu0 %v2026_v59, %s2220_s28 }
 0x215   : > { %2052 = vrot.lane.b32.xlu1 %v2031_v48, %s2220_s28 }
 0x216   : > { %2057 = vrot.lane.b32.xlu0 %v2036_v51, %s2220_s28 }
 0x219   : > { %2062 = vrot.lane.b32.xlu1 %v2021_v16, %s2221_s29 }
 0x21a   : > { %2067 = vrot.lane.b32.xlu0 %v2026_v59, %s2221_s29 }
 0x21d   : > { %2072 = vrot.lane.b32.xlu1 %v2031_v48, %s2221_s29 }
 0x21e   : > { %2077 = vrot.lane.b32.xlu0 %v2036_v51, %s2221_s29 }
 0x221   : > { %2082 = vrot.lane.b32.xlu1 %v2021_v16, %s2222_s30 }
 0x222   : > { %2087 = vrot.lane.b32.xlu0 %v2026_v59, %s2222_s30 }
 0x225   : > { %2092 = vrot.lane.b32.xlu1 %v2031_v48, %s2222_s30 }
 0x226   : > { %2097 = vrot.lane.b32.xlu0 %v2036_v51, %s2222_s30 }
 0x277   : > { %v2023_v13 = vpop.permute.xlu1 %2022 }
 0x278   : > { %v2025_v24 = vunpack.i.h.bf16 %v2023_v13  ;;  %v2024_v25 = vunpack.i.l.bf16 %v2023_v13  ;;  %v2028_v27 = vpop.permute.xlu0 %2027 }
 0x279   : > { %v2030_v28 = vunpack.i.h.bf16 %v2028_v27  ;;  %v2029_v33 = vunpack.i.l.bf16 %v2028_v27 }
 0x27b   : > { %v2660_v8 = vsel %vm431_vm0, %v2029_v33, %v2024_v25  ;;  %v2664_v39 = vsel %vm431_vm0, %v2030_v28, %v2025_v24  ;;  %v2668_v40 = vsel %vm431_vm0, %v2024_v25, %v2029_v33  ;;  %v2672_v62 = vsel %vm431_vm0, %v2025_v24, %v2030_v28 }
 0x27c   : > { %v2101_v9 = vpack.i.bf16 %v2664_v39, %v2660_v8  ;;  %v1125_v36 = vpack.c.bf16 %v2664_v39, %v2660_v8  ;;  %v2106_v43 = vpack.i.bf16 %v2672_v62, %v2668_v40  ;;  %v1126_v44 = vpack.c.bf16 %v2672_v62, %v2668_v40 }
 0x27e   : > { %2102 = vrot.lane.b32.xlu1 %v2101_v9, %s2221_s29  ;;  %2107 = vrot.lane.b32.xlu0 %v2106_v43, %s2221_s29 }
 0x27f   : > { %v2033_v35 = vpop.permute.xlu1 %2032 }
 0x280   : > { %v2035_v45 = vunpack.i.h.bf16 %v2033_v35  ;;  %v2034_v50 = vunpack.i.l.bf16 %v2033_v35  ;;  %v2038_v38 = vpop.permute.xlu0 %2037 }
 0x281   : > { %v2040_v42 = vunpack.i.h.bf16 %v2038_v38  ;;  %v2039_v53 = vunpack.i.l.bf16 %v2038_v38 }
 0x283   : > { %v2043_v54 = vpop.permute.xlu1 %2042  ;;  %v2686_v55 = vsel %vm431_vm0, %v2039_v53, %v2034_v50  ;;  %v2690_v16 = vsel %vm431_vm0, %v2040_v42, %v2035_v45  ;;  %v2694_v57 = vsel %vm431_vm0, %v2034_v50, %v2039_v53  ;;  %v2698_v58 = vsel %vm431_vm0, %v2035_v45, %v2040_v42 }
 0x284   : > { %v2045_v34 = vunpack.i.h.bf16 %v2043_v54  ;;  %v2044_v59 = vunpack.i.l.bf16 %v2043_v54  ;;  %v2048_v60 = vpop.permute.xlu0 %2047  ;;  %v2111_v63 = vpack.i.bf16 %v2690_v16, %v2686_v55  ;;  %v2116_v41 = vpack.i.bf16 %v2698_v58, %v2694_v57 }
 0x285   : > { %v2050_v61 = vunpack.i.h.bf16 %v2048_v60  ;;  %v2049_v23 = vunpack.i.l.bf16 %v2048_v60  ;;  %v3102_v40 = vpack.c.bf16 %v2698_v58, %v2694_v57 }
 0x286   : > { %2112 = vrot.lane.b32.xlu1 %v2111_v63, %s2221_s29  ;;  %2117 = vrot.lane.b32.xlu0 %v2116_v41, %s2221_s29 }
 0x287   : > { %v2053_v52 = vpop.permute.xlu1 %2052  ;;  %v2712_v15 = vsel %vm791_vm3, %v2044_v59, %v2049_v23  ;;  %v2716_v6 = vsel %vm791_vm3, %v2045_v34, %v2050_v61  ;;  %v2720_v7 = vsel %vm791_vm3, %v2049_v23, %v2044_v59  ;;  %v2724_v47 = vsel %vm791_vm3, %v2050_v61, %v2045_v34 }
 0x288   : > { %v2055_v48 = vunpack.i.h.bf16 %v2053_v52  ;;  %v2054_v51 = vunpack.i.l.bf16 %v2053_v52  ;;  %v2058_v13 = vpop.permute.xlu0 %2057  ;;  %v2131_v53 = vpack.i.bf16 %v2716_v6, %v2712_v15  ;;  %v2136_v60 = vpack.i.bf16 %v2724_v47, %v2720_v7 }
 0x289   : > { %v2060_v25 = vunpack.i.h.bf16 %v2058_v13  ;;  %v2059_v27 = vunpack.i.l.bf16 %v2058_v13  ;;  %v1132_v62 = vmul.bf16 %v3102_v40, %v2511_v26 }
 0x28a   : > { %2122 = vrot.lane.b32.xlu1 %v2101_v9, %s2222_s30  ;;  %2127 = vrot.lane.b32.xlu0 %v2106_v43, %s2222_s30 }
 0x28b   : > { %v2063_v33 = vpop.permute.xlu1 %2062  ;;  %v2734_v35 = vsel %vm791_vm3, %v2054_v51, %v2059_v27  ;;  %v2738_v45 = vsel %vm791_vm3, %v2055_v48, %v2060_v25  ;;  %v2742_v50 = vsel %vm791_vm3, %v2059_v27, %v2054_v51  ;;  %v2746_v9 = vsel %vm791_vm3, %v2060_v25, %v2055_v48 }
 0x28c   : > { %v2065_v38 = vunpack.i.h.bf16 %v2063_v33  ;;  %v2064_v42 = vunpack.i.l.bf16 %v2063_v33  ;;  %v2068_v43 = vpop.permute.xlu0 %2067  ;;  %v2151_v49 = vpack.i.bf16 %v2738_v45, %v2734_v35 }
 0x28d   : > { %v2070_v34 = vunpack.i.h.bf16 %v2068_v43  ;;  %v2069_v59 = vunpack.i.l.bf16 %v2068_v43 }
 0x28e   : > { %2132 = vrot.lane.b32.xlu1 %v2131_v53, %s2221_s29  ;;  %2137 = vrot.lane.b32.xlu0 %v2136_v60, %s2221_s29 }
 0x28f   : > { %v2073_v23 = vpop.permute.xlu1 %2072  ;;  %v1185_v52 = vsel %vm444_vm1, %v2064_v42, %v2069_v59  ;;  %v1186_v48 = vsel %vm444_vm1, %v2065_v38, %v2070_v34  ;;  %v1189_v51 = vsel %vm444_vm1, %v2069_v59, %v2064_v42  ;;  %v1190_v13 = vsel %vm444_vm1, %v2070_v34, %v2065_v38 }
 0x290   : > { %v2075_v25 = vunpack.i.h.bf16 %v2073_v23  ;;  %v2074_v27 = vunpack.i.l.bf16 %v2073_v23  ;;  %v2078_v33 = vpop.permute.xlu0 %2077  ;;  %v1194_v43 = vpack.c.bf16 %v1186_v48, %v1185_v52  ;;  %v1193_v54 = vpack.c.bf16 %v1190_v13, %v1189_v51 }
 0x291   : > { %v2080_v61 = vunpack.i.h.bf16 %v2078_v33  ;;  %v2079_v24 = vunpack.i.l.bf16 %v2078_v33 }
 0x292   : > { %2142 = vrot.lane.b32.xlu1 %v2111_v63, %s2222_s30  ;;  %v1198_v28 = vmul.bf16 %v1194_v43, %v2378_v46  ;;  %v1197_v20 = vmul.bf16 %v1193_v54, %v2420_v12  ;;  %2147 = vrot.lane.b32.xlu0 %v2116_v41, %s2222_s30 }
 0x293   : > { %v1188_v42 = vsel %vm444_vm1, %v2075_v25, %v2080_v61  ;;  %v1192_v38 = vsel %vm444_vm1, %v2080_v61, %v2075_v25  ;;  %v1187_v34 = vsel %vm444_vm1, %v2074_v27, %v2079_v24  ;;  %v1191_v59 = vsel %vm444_vm1, %v2079_v24, %v2074_v27  ;;  %v2083_v63 = vpop.permute.xlu1 %2082 }
 0x294   : > { %v2085_v23 = vunpack.i.h.bf16 %v2083_v63  ;;  %v2084_v54 = vunpack.i.l.bf16 %v2083_v63  ;;  %v2088_v52 = vpop.permute.xlu0 %2087  ;;  %1259 = vmatprep.subr.bf16.mxu1 %v1198_v28  ;;  %v1196_v48 = vpack.c.bf16 %v1188_v42, %v1187_v34  ;;  %v1195_v51 = vpack.c.bf16 %v1192_v38, %v1191_v59 }
 0x295   : > { %v2090_v13 = vunpack.i.h.bf16 %v2088_v52  ;;  %v2089_v33 = vunpack.i.l.bf16 %v2088_v52  ;;  %1260 = vmatpush1.bf16.msra.mxu1 %v1197_v20  ;;  %v2156_v61 = vpack.i.bf16 %v2746_v9, %v2742_v50 }
 0x296   : > { %2152 = vrot.lane.b32.xlu1 %v2151_v49, %s2221_s29  ;;  %v1200_v25 = vmul.bf16 %v1196_v48, %v2378_v46  ;;  %v1199_v24 = vmul.bf16 %v1195_v51, %v2420_v12  ;;  %v1561_v48 = vld [vmem:[%s3095_s6 + $0x10] sm:$0xff] }
 0x297   : > { %2157 = vrot.lane.b32.xlu0 %v2156_v61, %s2221_s29  ;;  %v2093_v41 = vpop.permute.xlu1 %2092  ;;  %v1226_v28 = vsel %vm518_vm2, %v2090_v13, %v2085_v23  ;;  %v1225_v27 = vsel %vm518_vm2, %v2089_v33, %v2084_v54  ;;  %v1222_v46 = vsel %vm518_vm2, %v2085_v23, %v2090_v13  ;;  %v1221_v12 = vsel %vm518_vm2, %v2084_v54, %v2089_v33  ;;  %v1591_v13 = vld [vmem:[%s3096_s7] sm:$0xff] }
 0x298   : > { %v2098_v43 = vpop.permute.xlu0 %2097  ;;  %1261 = vmatprep.subr.bf16.mxu1 %v1200_v25  ;;  %v2095_v20 = vunpack.i.h.bf16 %v2093_v41  ;;  %v2094_v42 = vunpack.i.l.bf16 %v2093_v41  ;;  %v1230_v59 = vpack.c.bf16 %v1226_v28, %v1225_v27  ;;  %v1562_v25 = vld [vmem:[%s3095_s6 + $0x18] sm:$0xff] }
 0x299   : > { %v2100_v38 = vunpack.i.h.bf16 %v2098_v43  ;;  %v2099_v34 = vunpack.i.l.bf16 %v2098_v43  ;;  %1262 = vmatpush1.bf16.msra.mxu1 %v1199_v24  ;;  %v2189_v24 = vld [vmem:[%s3094_s5 + $0x10] sm:$0xff]   ;;  %v2190_v41 = vld [vmem:[%s3094_s5 + $0x18] sm:$0xff]  }
 0x29a   : > { %1263 = vmatprep.subr.bf16.mxu1 %v2636_v2  ;;  %2162 = vrot.lane.b32.xlu1 %v2131_v53, %s2222_s30  ;;  %v1559_v2 = vld [vmem:[%s3095_s6] sm:$0xff]  ;;  %v1229_v53 = vpack.c.bf16 %v1222_v46, %v1221_v12 }
 0x29b   : > { %2167 = vrot.lane.b32.xlu0 %v2136_v60, %s2222_s30  ;;  %v1228_v63 = vsel %vm518_vm2, %v2100_v38, %v2095_v20  ;;  %v1227_v52 = vsel %vm518_vm2, %v2099_v34, %v2094_v42  ;;  %v1224_v60 = vsel %vm518_vm2, %v2095_v20, %v2100_v38  ;;  %v1223_v23 = vsel %vm518_vm2, %v2094_v42, %v2099_v34 }
 0x29c   : > { %v1233_v54 = vmul.bf16 %v1229_v53, %v2438_v31  ;;  %v1231_v51 = vpack.c.bf16 %v1224_v60, %v1223_v23 }
 0x29d   : > { %1264 = vmatpush1.bf16.msra.mxu1 %v2638_v3  ;;  %v1560_v3 = vld [vmem:[%s3095_s6 + $0x8] sm:$0xff] }
 0x29e   : > { %2172 = vrot.lane.b32.xlu1 %v2151_v49, %s2222_s30  ;;  %1265 = vmatprep.subr.bf16.mxu1 %v2641_v10  ;;  %v1234_v49 = vmul.bf16 %v1230_v59, %v2425_v19  ;;  %v1232_v10 = vpack.c.bf16 %v1228_v63, %v1227_v52 }
 0x29f   : > { %2177 = vrot.lane.b32.xlu0 %v2156_v61, %s2222_s30  ;;  %v1592_v61 = vld [vmem:[%s3096_s7 + $0x8] sm:$0xff] }
 0x2a0   : > { %v1236_v33 = vmul.bf16 %v1232_v10, %v2425_v19  ;;  %v1593_v19 = vld [vmem:[%s3096_s7 + $0x10] sm:$0xff] }
 0x2a1   : > { %1266 = vmatpush1.bf16.msra.mxu1 %v2643_v11  ;;  %v1235_v11 = vmul.bf16 %v1231_v51, %v2438_v31  ;;  %v1594_v31 = vld [vmem:[%s3096_s7 + $0x18] sm:$0xff] }
 0x2a2   : > { %1565 = vperm.xlu1 %2020, %v1559_v2   ;;  %1267 = vmatprep.subr.bf16.mxu1 %v1234_v49 }
 0x2a3   : > { %1570 = vperm.xlu0 %2019, %v1560_v3  }
 0x2a5   : > { %1268 = vmatpush1.bf16.msra.mxu1 %v1233_v54 }
 0x2a6   : > { %1575 = vperm.xlu1 %2020, %v1561_v48   ;;  %1269 = vmatprep.subr.bf16.mxu1 %v1236_v33 }
 0x2a7   : > { %1597 = vperm.xlu0 %2019, %v1591_v13  }
 0x2a9   : > { %1270 = vmatpush1.bf16.msra.mxu1 %v1235_v11 }
 0x2aa   : > { %1602 = vperm.xlu1 %2020, %v1592_v61  }
 0x2ab   : > { %1580 = vperm.xlu0 %2019, %v1562_v25  }
 0x2ac   : > { %1859 = vmatmul.mubr.msk.bf16.vlgmr.msra.gmra.mrb[0].mxu1 %vm1252_vm5, %v2189_v24 }
 0x2ad   : > { %1301 = vmatprep.mubr.bf16.mxu1 %v2224_v22 }
 0x2ae   : > { %1607 = vperm.xlu1 %2020, %v1593_v19  }
 0x2af   : > { %1612 = vperm.xlu0 %2019, %v1594_v31  }
 0x2b4   : > { %1860 = vmatmul.mubr.msk.bf16.gmra.mrb[4].mxu1 %vm1252_vm5, %v2190_v41 }
 0x2b5   : > { %1360 = vmatprep.mubr.bf16.mxu1 %v2224_v22 }
 0x2f0   : > { %v2103_v28 = vpop.permute.xlu1 %2102  ;;  %v2108_v27 = vpop.permute.xlu0 %2107 }
 0x2f1   : > { %v2105_v43 = vunpack.i.h.bf16 %v2103_v28  ;;  %v2104_v20 = vunpack.i.l.bf16 %v2103_v28  ;;  %v2110_v42 = vunpack.i.h.bf16 %v2108_v27  ;;  %v2109_v38 = vunpack.i.l.bf16 %v2108_v27 }
 0x2f3   : > { %v1110_v34 = vsel %vm444_vm1, %v2105_v43, %v2110_v42  ;;  %v1114_v46 = vsel %vm444_vm1, %v2110_v42, %v2105_v43  ;;  %v1109_v12 = vsel %vm444_vm1, %v2104_v20, %v2109_v38  ;;  %v1113_v59 = vsel %vm444_vm1, %v2109_v38, %v2104_v20 }
 0x2f4   : > { %v1117_v63 = vpack.c.bf16 %v1114_v46, %v1113_v59  ;;  %v1118_v52 = vpack.c.bf16 %v1110_v34, %v1109_v12  ;;  %v1130_v59 = vmul.bf16 %v1126_v44, %v2511_v26 }
 0x2f6   : > { %v1122_v2 = vmul.bf16 %v1118_v52, %v2515_v30  ;;  %v1121_v53 = vmul.bf16 %v1117_v63, %v2518_v32 }
 0x2f8   : > { %v2113_v60 = vpop.permute.xlu1 %2112  ;;  %1328 = vmatprep.subr.bf16.mxu1 %v1122_v2  ;;  %v2118_v49 = vpop.permute.xlu0 %2117 }
 0x2f9   : > { %v2115_v23 = vunpack.i.h.bf16 %v2113_v60  ;;  %v2114_v3 = vunpack.i.l.bf16 %v2113_v60  ;;  %1329 = vmatpush1.bf16.msra.mxu1 %v1121_v53  ;;  %v2120_v10 = vunpack.i.h.bf16 %v2118_v49  ;;  %v2119_v54 = vunpack.i.l.bf16 %v2118_v49 }
 0x2fb   : > { %v1112_v48 = vsel %vm444_vm1, %v2115_v23, %v2120_v10  ;;  %v1116_v51 = vsel %vm444_vm1, %v2120_v10, %v2115_v23  ;;  %v1111_v13 = vsel %vm444_vm1, %v2114_v3, %v2119_v54  ;;  %v1115_v33 = vsel %vm444_vm1, %v2119_v54, %v2114_v3 }
 0x2fc   : > { %v2123_v11 = vpop.permute.xlu1 %2122  ;;  %v1119_v61 = vpack.c.bf16 %v1116_v51, %v1115_v33  ;;  %v2128_v19 = vpop.permute.xlu0 %2127  ;;  %v1120_v31 = vpack.c.bf16 %v1112_v48, %v1111_v13  ;;  %v3103_v51 = vpack.c.bf16 %v2690_v16, %v2686_v55 }
 0x2fd   : > { %v2125_v25 = vunpack.i.h.bf16 %v2123_v11  ;;  %v2124_v24 = vunpack.i.l.bf16 %v2123_v11  ;;  %v2130_v41 = vunpack.i.h.bf16 %v2128_v19  ;;  %v2129_v28 = vunpack.i.l.bf16 %v2128_v19 }
 0x2fe   : > { %v1124_v27 = vmul.bf16 %v1120_v31, %v2515_v30  ;;  %v1123_v43 = vmul.bf16 %v1119_v61, %v2518_v32  ;;  %v1129_v32 = vmul.bf16 %v1125_v36, %v2508_v21  ;;  %v1131_v13 = vmul.bf16 %v3103_v51, %v2508_v21 }
 0x2ff   : > { %v1154_v20 = vsel %vm518_vm2, %v2130_v41, %v2125_v25  ;;  %v1153_v42 = vsel %vm518_vm2, %v2129_v28, %v2124_v24  ;;  %v1150_v52 = vsel %vm518_vm2, %v2125_v25, %v2130_v41  ;;  %v1149_v2 = vsel %vm518_vm2, %v2124_v24, %v2129_v28 }
 0x300   : > { %v2133_v38 = vpop.permute.xlu1 %2132  ;;  %v2138_v12 = vpop.permute.xlu0 %2137  ;;  %1330 = vmatprep.subr.bf16.mxu1 %v1124_v27  ;;  %v1158_v44 = vpack.c.bf16 %v1154_v20, %v1153_v42  ;;  %v1157_v54 = vpack.c.bf16 %v1150_v52, %v1149_v2 }
 0x301   : > { %v2135_v34 = vunpack.i.h.bf16 %v2133_v38  ;;  %v2134_v46 = vunpack.i.l.bf16 %v2133_v38  ;;  %v2140_v63 = vunpack.i.h.bf16 %v2138_v12  ;;  %v2139_v30 = vunpack.i.l.bf16 %v2138_v12  ;;  %1331 = vmatpush1.bf16.msra.mxu1 %v1123_v43 }
 0x302   : > { %1332 = vmatprep.subr.bf16.mxu1 %v1130_v59  ;;  %v1162_v21 = vmul.bf16 %v1158_v44, %v2554_v17  ;;  %v1161_v20 = vmul.bf16 %v1157_v54, %v2557_v0 }
 0x303   : > { %v1422_v53 = vsel %vm444_vm1, %v2135_v34, %v2140_v63  ;;  %v1426_v8 = vsel %vm444_vm1, %v2140_v63, %v2135_v34  ;;  %v1421_v39 = vsel %vm444_vm1, %v2134_v46, %v2139_v30  ;;  %v1425_v36 = vsel %vm444_vm1, %v2139_v30, %v2134_v46 }
 0x304   : > { %v2143_v60 = vpop.permute.xlu1 %2142  ;;  %v1429_v23 = vpack.c.bf16 %v1426_v8, %v1425_v36  ;;  %v2148_v10 = vpop.permute.xlu0 %2147  ;;  %v1430_v57 = vpack.c.bf16 %v1422_v53, %v1421_v39 }
 0x305   : > { %v2145_v3 = vunpack.i.h.bf16 %v2143_v60  ;;  %v2144_v49 = vunpack.i.l.bf16 %v2143_v60  ;;  %v2150_v26 = vunpack.i.h.bf16 %v2148_v10  ;;  %v2149_v58 = vunpack.i.l.bf16 %v2148_v10  ;;  %1333 = vmatpush1.bf16.msra.mxu1 %v1129_v32 }
 0x306   : > { %1334 = vmatprep.subr.bf16.mxu1 %v1132_v62  ;;  %v1434_v48 = vmul.bf16 %v1430_v57, %v2560_v1  ;;  %v1433_v33 = vmul.bf16 %v1429_v23, %v2572_v37  ;;  %v3104_v23 = vpack.c.bf16 %v2724_v47, %v2720_v7  ;;  %v3105_v57 = vpack.c.bf16 %v2716_v6, %v2712_v15 }
 0x307   : > { %v1152_v11 = vsel %vm518_vm2, %v2145_v3, %v2150_v26  ;;  %v1156_v61 = vsel %vm518_vm2, %v2150_v26, %v2145_v3  ;;  %v1151_v25 = vsel %vm518_vm2, %v2144_v49, %v2149_v58  ;;  %v1155_v24 = vsel %vm518_vm2, %v2149_v58, %v2144_v49 }
 0x308   : > { %v2153_v19 = vpop.permute.xlu1 %2152  ;;  %1498 = vmatprep.subr.bf16.mxu0 %v1434_v48  ;;  %v1160_v55 = vpack.c.bf16 %v1156_v61, %v1155_v24  ;;  %v1159_v43 = vpack.c.bf16 %v1152_v11, %v1151_v25  ;;  %v1442_v3 = vmul.bf16 %v3104_v23, %v2580_v56  ;;  %v1441_v26 = vmul.bf16 %v3105_v57, %v2599_v14  ;;  %v2192_v61 = vld [vmem:[%s3094_s5 + $0x8] sm:$0xff]   ;;  %v2193_v25 = vld [vmem:[%s3094_s5 + $0x20] sm:$0xff]  }
 0x309   : > { %v2155_v31 = vunpack.i.h.bf16 %v2153_v19  ;;  %v2154_v41 = vunpack.i.l.bf16 %v2153_v19  ;;  %v2158_v28 = vpop.permute.xlu0 %2157  ;;  %1335 = vmatpush1.bf16.msra.mxu1 %v1131_v13  ;;  %1499 = vmatpush1.bf16.msra.mxu0 %v1433_v33  ;;  %v3106_v58 = vpack.c.bf16 %v2746_v9, %v2742_v50  ;;  %v3107_v13 = vpack.c.bf16 %v2738_v45, %v2734_v35 }
 0x30a   : > { %v2160_v16 = vunpack.i.h.bf16 %v2158_v28  ;;  %v2159_v27 = vunpack.i.l.bf16 %v2158_v28  ;;  %1336 = vmatprep.subr.bf16.mxu1 %v1162_v21  ;;  %v1164_v42 = vmul.bf16 %v1160_v55, %v2554_v17  ;;  %v1163_v8 = vmul.bf16 %v1159_v43, %v2557_v0 }
 0x30b   : > { %v1444_v54 = vmul.bf16 %v3106_v58, %v2580_v56  ;;  %v1443_v11 = vmul.bf16 %v3107_v13, %v2599_v14 }
 0x30c   : > { %v1424_v38 = vsel %vm444_vm1, %v2155_v31, %v2160_v16  ;;  %v1428_v34 = vsel %vm444_vm1, %v2160_v16, %v2155_v31  ;;  %v1423_v46 = vsel %vm444_vm1, %v2154_v41, %v2159_v27  ;;  %v1427_v12 = vsel %vm444_vm1, %v2159_v27, %v2154_v41  ;;  %v2163_v59 = vpop.permute.xlu1 %2162 }
 0x30d   : > { %v1431_v63 = vpack.c.bf16 %v1428_v34, %v1427_v12  ;;  %v2165_v30 = vunpack.i.h.bf16 %v2163_v59  ;;  %v2164_v32 = vunpack.i.l.bf16 %v2163_v59  ;;  %v2168_v52 = vpop.permute.xlu0 %2167  ;;  %v1432_v2 = vpack.c.bf16 %v1424_v38, %v1423_v46  ;;  %1337 = vmatpush1.bf16.msra.mxu1 %v1161_v20 }
 0x30e   : > { %v2170_v40 = vunpack.i.h.bf16 %v2168_v52  ;;  %v2169_v17 = vunpack.i.l.bf16 %v2168_v52  ;;  %1338 = vmatprep.subr.bf16.mxu1 %v1164_v42 }
 0x30f   : > { %v1436_v62 = vmul.bf16 %v1432_v2, %v2560_v1  ;;  %v1435_v44 = vmul.bf16 %v1431_v63, %v2572_v37  ;;  %v2191_v1 = vld [vmem:[%s3094_s5] sm:$0xff]  }
 0x310   : > { %v2173_v53 = vpop.permute.xlu1 %2172  ;;  %v1466_v39 = vsel %vm518_vm2, %v2170_v40, %v2165_v30  ;;  %v1465_v36 = vsel %vm518_vm2, %v2169_v17, %v2164_v32  ;;  %v1462_v7 = vsel %vm518_vm2, %v2165_v30, %v2170_v40  ;;  %v1461_v47 = vsel %vm518_vm2, %v2164_v32, %v2169_v17 }
 0x311   : > { %v2178_v60 = vpop.permute.xlu0 %2177  ;;  %1500 = vmatprep.subr.bf16.mxu0 %v1436_v62  ;;  %v2175_v37 = vunpack.i.h.bf16 %v2173_v53  ;;  %v2174_v49 = vunpack.i.l.bf16 %v2173_v53  ;;  %1339 = vmatpush1.bf16.msra.mxu1 %v1163_v8  ;;  %v1469_v6 = vpack.c.bf16 %v1462_v7, %v1461_v47 }
 0x312   : > { %v2180_v0 = vunpack.i.h.bf16 %v2178_v60  ;;  %v2179_v10 = vunpack.i.l.bf16 %v2178_v60  ;;  %1501 = vmatpush1.bf16.msra.mxu0 %v1435_v44  ;;  %1881 = vmatprep.subr.bf16.mxu1 %v1434_v48  ;;  %v1470_v48 = vpack.c.bf16 %v1466_v39, %v1465_v36 }
 0x313   : > { %1502 = vmatprep.subr.bf16.mxu0 %v1442_v3  ;;  %v1473_v35 = vmul.bf16 %v1469_v6, %v2615_v29 }
 0x314   : > { %1863 = vmatmul.mubr.msk.bf16.vlgmr.msra.gmra.mrb[0].mxu1 %vm1252_vm5, %v2191_v1  ;;  %v1468_v51 = vsel %vm518_vm2, %v2180_v0, %v2175_v37  ;;  %v1467_v15 = vsel %vm518_vm2, %v2179_v10, %v2174_v49  ;;  %v1464_v56 = vsel %vm518_vm2, %v2175_v37, %v2180_v0  ;;  %v1463_v50 = vsel %vm518_vm2, %v2174_v49, %v2179_v10 }
 0x315   : > { %1887 = vmatpush1.bf16.msra.mxu1 %v1433_v33  ;;  %1370 = vmatprep.mubr.bf16.mxu1 %v2224_v22  ;;  %v1474_v9 = vmul.bf16 %v1470_v48, %v2607_v4  ;;  %v1472_v33 = vpack.c.bf16 %v1468_v51, %v1467_v15  ;;  %v1471_v14 = vpack.c.bf16 %v1464_v56, %v1463_v50 }
 0x316   : > { %1503 = vmatpush1.bf16.msra.mxu0 %v1441_v26  ;;  %1882 = vmatprep.subr.bf16.mxu1 %v1436_v62 }
 0x317   : > { %1504 = vmatprep.subr.bf16.mxu0 %v1444_v54  ;;  %v1476_v45 = vmul.bf16 %v1472_v33, %v2607_v4  ;;  %v1475_v18 = vmul.bf16 %v1471_v14, %v2615_v29  ;;  %v2194_v4 = vld [vmem:[%s3094_s5 + $0x28] sm:$0xff]  }
 0x318   : > { %v1649_v33 = vld [vmem:[%s3097_s8 + $0x8] sm:$0xff] }
 0x319   : > { %1888 = vmatpush1.bf16.msra.mxu1 %v1435_v44 }
 0x31a   : > { %1505 = vmatpush1.bf16.msra.mxu0 %v1443_v11  ;;  %1883 = vmatprep.subr.bf16.mxu1 %v1442_v3 }
 0x31b   : > { %1506 = vmatprep.subr.bf16.mxu0 %v1474_v9 }
 0x31c   : > { %1864 = vmatmul.mubr.msk.bf16.gmra.mrb[4].mxu1 %vm1252_vm5, %v2192_v61 }
 0x31d   : > { %1889 = vmatpush1.bf16.msra.mxu1 %v1441_v26  ;;  %1540 = vmatprep.mubr.bf16.mxu1 %v2224_v22 }
 0x31e   : > { %1507 = vmatpush1.bf16.msra.mxu0 %v1473_v35  ;;  %1884 = vmatprep.subr.bf16.mxu1 %v1444_v54 }
 0x31f   : > { %1508 = vmatprep.subr.bf16.mxu0 %v1476_v45 }
 0x321   : > { %1890 = vmatpush1.bf16.msra.mxu1 %v1443_v11  ;;  %v1566_v31 = vpop.permute.xlu1 %1565 }
 0x322   : > { %1509 = vmatpush1.bf16.msra.mxu0 %v1475_v18  ;;  %1885 = vmatprep.subr.bf16.mxu1 %v1474_v9  ;;  %v1571_v41 = vpop.permute.xlu0 %1570  ;;  %v1648_v9 = vld [vmem:[%s3097_s8] sm:$0xff] }
 0x325   : > { %1871 = vmatmul.mubr.msk.bf16.vlgmr.msra.gmra.mrb[8].mxu0 %vm1252_vm5, %v2193_v25  ;;  %1891 = vmatpush1.bf16.msra.mxu1 %v1473_v35  ;;  %v1576_v28 = vpop.permute.xlu1 %1575 }
 0x326   : > { %1886 = vmatprep.subr.bf16.mxu1 %v1476_v45  ;;  %v1598_v21 = vpop.permute.xlu0 %1597 }
 0x329   : > { %1892 = vmatpush1.bf16.msra.mxu1 %v1475_v18  ;;  %v1603_v46 = vpop.permute.xlu1 %1602  ;;  %v1650_v18 = vld [vmem:[%s3097_s8 + $0x10] sm:$0xff] }
 0x32a   : > { %v1581_v32 = vpop.permute.xlu0 %1580 }
 0x32c   : > { %1872 = vmatmul.mubr.msk.bf16.vlgmr.msra.gmra.mrb[4].mxu1 %vm1252_vm5, %v2194_v4 }
 0x32d   : > { %v1608_v60 = vpop.permute.xlu1 %1607 }
 0x32e   : > { %v1613_v57 = vpop.permute.xlu0 %1612 }
 0x3e7   : > { %v1362_v29 = vpop.f32.mrb[0].mxu1 }
 0x3e8   : > { %v1364_v22 = vpop.f32.mrb[1].mxu1 }
 0x3e9   : > { %v1366_v24 = vpop.f32.mrb[2].mxu1 }
 0x3ea   : > { %v1368_v19 = vpop.f32.mrb[3].mxu1 }
 0x3f8   : > { %v1532_v55 = vpop.f32.mrb[8].mxu0 }
 0x3f9   : > { %v1893_v16 = vadd.f32 %v1532_v55, %v1362_v29  ;;  %v1534_v27 = vpop.f32.mrb[9].mxu0 }
 0x3fa   : > { %v1894_v43 = vadd.f32 %v1534_v27, %v1364_v22  ;;  %v1536_v20 = vpop.f32.mrb[10].mxu0  ;;  %v1651_v22 = vld [vmem:[%s3097_s8 + $0x18] sm:$0xff] }
 0x3fb   : > { %v1583_v42 = vmul.f32 %v1893_v16, %v1566_v31  ;;  %v1895_v38 = vadd.f32 %v1536_v20, %v1366_v24  ;;  %v1538_v34 = vpop.f32.mrb[11].mxu0 }
 0x3fc   : > { %v1584_v12 = vmul.f32 %v1894_v43, %v1566_v31  ;;  %v1896_v59 = vadd.f32 %v1538_v34, %v1368_v19 }
 0x3fd   : > { %v1585_v63 = vmul.f32 %v1895_v38, %v1571_v41  ;;  %v2978_v30 = vadd.f32 %v1598_v21, %v1583_v42 }
 0x3fe   : > { %v1586_v52 = vmul.f32 %v1896_v59, %v1571_v41  ;;  %v2980_v2 = vadd.f32 %v1598_v21, %v1584_v12  ;;  %v1670_v12 = vld [vmem:[%s3098_s9] sm:$0x1] }
 0x3ff   : > { %v1623_v40 = vmax.f32 %v2978_v30, 0.0  ;;  %v2983_v17 = vadd.f32 %v1603_v46, %v1585_v63  ;;  %v1542_v62 = vpop.f32.mrb[4].mxu1 }
 0x400   : > { %v1624_v44 = vmax.f32 %v2980_v2, 0.0  ;;  %v2986_v53 = vadd.f32 %v1603_v46, %v1586_v52  ;;  %v1587_v8 = vmul.f32 %v1576_v28, %v1542_v62  ;;  %v1544_v39 = vpop.f32.mrb[5].mxu1  ;;  %v1674_v52 = vld [vmem:[%s3099_s10 + $0x8] sm:$0xff]  ;;  %v1673_v62 = vld [vmem:[%s3099_s10] sm:$0xff] }
 0x401   : > { %v1625_v36 = vmax.f32 %v2983_v17, 0.0  ;;  %v1588_v23 = vmul.f32 %v1576_v28, %v1544_v39  ;;  %v1546_v3 = vpop.f32.mrb[6].mxu1  ;;  %v1676_v39 = vld [vmem:[%s3099_s10 + $0x18] sm:$0xff] }
 0x402   : > { %v1631_v1 = vadd.f32 %v1624_v44, %v1623_v40  ;;  %v1626_v37 = vmax.f32 %v2986_v53, 0.0  ;;  %v2994_v49 = vadd.f32 %v1608_v60, %v1587_v8  ;;  %v1589_v0 = vmul.f32 %v1581_v32, %v1546_v3  ;;  %v1548_v10 = vpop.f32.mrb[7].mxu1 }
 0x403   : > { %v2996_v26 = vadd.f32 %v1608_v60, %v1588_v23  ;;  %v1590_v7 = vmul.f32 %v1581_v32, %v1548_v10  ;;  %v1675_v60 = vld [vmem:[%s3099_s10 + $0x10] sm:$0xff] }
 0x404   : > { %1632 = vadd.xlane.f32.xlu1 %v1631_v1  ;;  %v1634_v47 = vadd.f32 %v1626_v37, %v1625_v36  ;;  %v1627_v58 = vmax.f32 %v2994_v49, 0.0  ;;  %v3003_v54 = vadd.f32 %v1613_v57, %v1589_v0 }
 0x405   : > { %v1628_v48 = vmax.f32 %v2996_v26, 0.0  ;;  %v3006_v51 = vadd.f32 %v1613_v57, %v1590_v7 }
 0x406   : > { %1635 = vadd.xlane.f32.xlu0 %v1634_v47  ;;  %v1629_v15 = vmax.f32 %v3003_v54, 0.0  ;;  %v1698_v47 = vld [vmem:[%s3100_s11 + $0x8] sm:$0xff] }
 0x407   : > { %v1630_v6 = vmax.f32 %v3006_v51, 0.0  ;;  %v1637_v13 = vadd.f32 %v1628_v48, %v1627_v58 }
 0x409   : > { %v1640_v11 = vadd.f32 %v1630_v6, %v1629_v15 }
 0x40a   : > { %1638 = vadd.xlane.f32.xlu0 %v1637_v13  ;;  %v1697_v13 = vld [vmem:[%s3100_s11] sm:$0xff] }
 0x40b   : > { %1641 = vadd.xlane.f32.xlu1 %v1640_v11 }
 0x491   : > { %v1633_v56 = vpop.xlane.xlu1 %1632 }
 0x492   : > { %v1644_v50 = vmul.f32 0.00390625, %v1633_v56 }
 0x493   : > { %v1636_v61 = vpop.xlane.xlu0 %1635 }
 0x494   : > { %v1645_v14 = vmul.f32 0.00390625, %v1636_v61  ;;  %v1652_v35 = vmul.f32 %v1648_v9, %v1644_v50  ;;  %v1699_v61 = vld [vmem:[%s3100_s11 + $0x10] sm:$0xff] }
 0x496   : > { %v1653_v45 = vmul.f32 %v1649_v33, %v1645_v14  ;;  %v1657_v19 = vsel %vm1656_vm6, %v1652_v35, 0.0  ;;  %v1700_v33 = vld [vmem:[%s3100_s11 + $0x18] sm:$0xff] }
 0x497   : > { %v1639_v25 = vpop.xlane.xlu0 %1638 }
 0x498   : > { %v1658_v4 = vsel %vm1656_vm6, %v1653_v45, 0.0  ;;  %v1646_v29 = vmul.f32 0.00390625, %v1639_v25  ;;  %v1642_v24 = vpop.xlane.xlu1 %1641 }
 0x499   : > { %v1647_v41 = vmul.f32 0.00390625, %v1642_v24  ;;  %v1659_v28 = vadd.f32 %v1658_v4, %v1657_v19 }
 0x49a   : > { %v1654_v31 = vmul.f32 %v1650_v18, %v1646_v29 }
 0x49b   : > { %v1655_v55 = vmul.f32 %v1651_v22, %v1647_v41 }
 0x49c   : > { %v1660_v21 = vsel %vm1656_vm6, %v1654_v31, 0.0 }
 0x49d   : > { %v1661_v16 = vadd.f32 %v1660_v21, %v1659_v28  ;;  %v1662_v27 = vsel %vm1656_vm6, %v1655_v55, 0.0 }
 0x49f   : > { %v1663_v43 = vadd.f32 %v1662_v27, %v1661_v16 }
 0x4a1   : > { %v1664_v20 = vrot.slane %v1663_v43, 4 }
 0x4a3   : > { %v1665_v42 = vadd.f32 %v1664_v20, %v1663_v43 }
 0x4a5   : > { %v1666_v38 = vrot.slane %v1665_v42, 2 }
 0x4a7   : > { %v1667_v34 = vadd.f32 %v1666_v38, %v1665_v42 }
 0x4a9   : > { %v1668_v46 = vrot.slane %v1667_v34, 1 }
 0x4ab   : > { %v1669_v59 = vadd.f32 %v1668_v46, %v1667_v34 }
 0x4ad   : > { %v1671_v63 = vadd.f32 %v1670_v12, %v1669_v59 }
 0x4af   : > { %v1672_v32 = vmax.f32 %v1671_v63, 0.0 }
 0x4b1   : > { %v1680_v8 = vrot.slane %v1672_v32, %v2501_v5 }
 0x4b3   : > { %v1682_v23 = vmul.f32 %v1680_v8, %v1674_v52  ;;  %v1681_v3 = vmul.f32 %v1680_v8, %v1673_v62  ;;  %v1684_v10 = vmul.f32 %v1680_v8, %v1676_v39  ;;  %v1683_v57 = vmul.f32 %v1680_v8, %v1675_v60 }
 0x4b5   : > { %v1688_v1 = vsel %vm1656_vm6, %v1682_v23, 0.0  ;;  %v1685_v0 = vsel %vm1656_vm6, %v1681_v3, 0.0  ;;  %v1694_v5 = vsel %vm1656_vm6, %v1684_v10, 0.0  ;;  %v1691_v7 = vsel %vm1656_vm6, %v1683_v57, 0.0 }
 0x4b6   : > { %1689 = vadd.xlane.f32.xlu1 %v1688_v1  ;;  %1686 = vadd.xlane.f32.xlu0 %v1685_v0 }
 0x4ba   : > { %1695 = vadd.xlane.f32.xlu1 %v1694_v5  ;;  %1692 = vadd.xlane.f32.xlu0 %v1691_v7 }
 0x543   : > { %v1690_v11 = vpop.xlane.xlu1 %1689  ;;  %v1687_v56 = vpop.xlane.xlu0 %1686 }
 0x544   : > { %v1702_v50 = vadd.f32 %v1698_v47, %v1690_v11  ;;  %v1701_v9 = vadd.f32 %v1697_v13, %v1687_v56 }
 0x546   : > { %v1874_v14 = vmul.f32 -1.442695, %v1702_v50  ;;  %v1873_v35 = vmul.f32 -1.442695, %v1701_v9 }
 0x547   : > { %v1696_v45 = vpop.xlane.xlu1 %1695  ;;  %v1693_v18 = vpop.xlane.xlu0 %1692 }
 0x548   : > { %2195 = vpow2.f32 %v1874_v14  ;;  %v1704_v25 = vadd.f32 %v1700_v33, %v1696_v45  ;;  %v1703_v4 = vadd.f32 %v1699_v61, %v1693_v18 }
 0x549   : > { %2197 = vpow2.f32 %v1873_v35 }
 0x54a   : > { %v1876_v29 = vmul.f32 -1.442695, %v1704_v25  ;;  %v1875_v22 = vmul.f32 -1.442695, %v1703_v4 }
 0x54c   : > { %2199 = vpow2.f32 %v1876_v29 }
 0x54d   : > { %2201 = vpow2.f32 %v1875_v22 }
 0x552   : > { %v2196_v24 = vpop.eup %2195 }
 0x553   : > { %v2198_v19 = vpop.eup %2197  ;;  %v1718_v31 = vadd.f32 1.0, %v2196_v24 }
 0x554   : > { %v1717_v41 = vadd.f32 1.0, %v2198_v19 }
 0x555   : > { %2203 = vrcp.f32 %v1718_v31 }
 0x556   : > { %v2200_v28 = vpop.eup %2199  ;;  %2205 = vrcp.f32 %v1717_v41 }
 0x557   : > { %v2202_v21 = vpop.eup %2201  ;;  %v1720_v55 = vadd.f32 1.0, %v2200_v28 }
 0x558   : > { %v1719_v16 = vadd.f32 1.0, %v2202_v21 }
 0x559   : > { %2207 = vrcp.f32 %v1720_v55 }
 0x55a   : > { %2209 = vrcp.f32 %v1719_v16 }
 0x55f   : > { %v2204_v27 = vpop.eup %2203 }
 0x560   : > { %v2206_v43 = vpop.eup %2205  ;;  %1736 = vperm.xlu1 %2020, %v2204_v27  }
 0x561   : > { %1731 = vperm.xlu0 %2019, %v2206_v43  }
 0x563   : > { %v2208_v20 = vpop.eup %2207 }
 0x564   : > { %v2210_v42 = vpop.eup %2209 }
 0x565   : > { %1746 = vperm.xlu0 %2019, %v2208_v20   ;;  %1741 = vperm.xlu1 %2020, %v2210_v42  }
 0x5df   : > { %v1737_v38 = vpop.permute.xlu1 %1736 }
 0x5e0   : > { %v1751_v34 = vmul.f32 %v1737_v38, %v1625_v36  ;;  %v1752_v46 = vmul.f32 %v1737_v38, %v1626_v37  ;;  %v1732_v12 = vpop.permute.xlu0 %1731 }
 0x5e1   : > { %v1749_v59 = vmul.f32 %v1732_v12, %v1623_v40  ;;  %v1750_v63 = vmul.f32 %v1732_v12, %v1624_v44 }
 0x5e2   : > { %1759 = vst [vmem:[%s413_s16 + $0x10] sm:$0xff] %v1751_v34  ;;  %1760 = vst [vmem:[%s413_s16 + $0x18] sm:$0xff] %v1752_v46 }
 0x5e3   : > { %1757 = vst [vmem:[%s413_s16] sm:$0xff] %v1749_v59  ;;  %1758 = vst [vmem:[%s413_s16 + $0x8] sm:$0xff] %v1750_v63 }
 0x5e4   : > { %v1742_v32 = vpop.permute.xlu1 %1741  ;;  %v1747_v52 = vpop.permute.xlu0 %1746 }
 0x5e5   : > { %v1753_v17 = vmul.f32 %v1742_v32, %v1627_v58  ;;  %v1754_v53 = vmul.f32 %v1742_v32, %v1628_v48  ;;  %v1755_v36 = vmul.f32 %v1747_v52, %v1629_v15  ;;  %v1756_v30 = vmul.f32 %v1747_v52, %v1630_v6 }
 0x5e7   : > { %1761 = vst [vmem:[%s413_s16 + $0x20] sm:$0xff] %v1753_v17  ;;  %1762 = vst [vmem:[%s413_s16 + $0x28] sm:$0xff] %v1754_v53 }
 0x5e8   : > { %1763 = vst [vmem:[%s413_s16 + $0x30] sm:$0xff] %v1755_v36  ;;  %1764 = vst [vmem:[%s413_s16 + $0x38] sm:$0xff] %v1756_v30 }
 0x5e9 PF: > { %s22_s21 = sadd.s32 1, %s2217_s21  }
 0x5ea   : > { %p19_p4 = scmp.ge.s32.totalorder %s22_s21, 4  }
 0x5ec   :  { %21 = sbr.rel (!%p19_p4) target bundleno = 1 (0x1), region = 102 }

</bundles_post_ra>
